<compile_context>
chip_gen: v7x
topology: tpu7x:2x2x1
jax: 0.10.0
libtpu: 0.0.40
codegen_flags: <defaults>
</compile_context>

<pallas_src>
import functools
import math

import jax
import jax.numpy as jnp
from jax import lax
from jax.experimental import pallas as pl
from jax.experimental.pallas import tpu as pltpu

NEG_SLOPE = 0.2       # LeakyReLU negative slope (l_alpha)
MASK_BIG = 1e30       # additive bias magnitude for non-edges
SCORE_BLK = 128       # lane width reserved for the folded attention-score columns


def _round_up(x, m):
    return ((x + m - 1) // m) * m


def _col_layout(padP, padA):
    """Column layout of the single fused weight matrix W_all.

    P section: [ W_P (padP) | W_p2p (padP) | W_p2a (padA) | P score block (128) ]
    A section: [ W_A (padA) | W_a2p (padP) | W_a2a (padA) | A score block (128) ]
    Score block lanes: [src_rel0 | src_rel1 | dst_rel0 | dst_rel1], H lanes each.
    """
    WP_tot = 2 * padP + padA + SCORE_BLK
    WA_tot = 2 * padA + padP + SCORE_BLK
    scP0 = 2 * padP + padA                 # offset of P score block (multiple of 128)
    scA0 = WP_tot + 2 * padA + padP        # offset of A score block (multiple of 128)
    return WP_tot, WA_tot, scP0, scA0


# ----------------------------------------------------------------------------- #
# Kernel
# ----------------------------------------------------------------------------- #
def hetgat_kernel(H, dP, dA, padP, padA, Np_pad, Na_pad,
                  feat_ref, w_ref,
                  adj_pp_ref, adj_pa_ref, adj_ap_ref, adj_aa_ref,
                  hP_ref, hA_ref):
    WP_tot, _, scP0, scA0 = _col_layout(padP, padA)

    # One fused matmul: all six Linear transforms + all eight attention-score
    # projections for both node types (biases folded in via a constant-1 column).
    Wh = jnp.dot(feat_ref[...], w_ref[...], preferred_element_type=jnp.float32)

    # Static slices at 8-/128-aligned offsets (P rows first, then A rows).
    Whp   = Wh[0:Np_pad, 0:padP]                                  # (Np, padP) self
    Whp2p = Wh[0:Np_pad, padP:2 * padP]                           # (Np, padP)
    Whp2a = Wh[0:Np_pad, 2 * padP:2 * padP + padA]                # (Np, padA)
    scP   = Wh[0:Np_pad, scP0:scP0 + SCORE_BLK]                   # (Np, 128) scores
    Wha   = Wh[Np_pad:Np_pad + Na_pad, WP_tot:WP_tot + padA]      # (Na, padA) self
    Wha2p = Wh[Np_pad:Np_pad + Na_pad, WP_tot + padA:WP_tot + padA + padP]
    Wha2a = Wh[Np_pad:Np_pad + Na_pad, WP_tot + padA + padP:WP_tot + 2 * padA + padP]
    scA   = Wh[Np_pad:Np_pad + Na_pad, scA0:scA0 + SCORE_BLK]     # (Na, 128) scores

    # Transpose each score slab once (heads land on sublanes) instead of 8 tiny
    # per-vector transposes.
    scPT = scP.T                                                   # (128, Np_pad)
    scAT = scA.T                                                   # (128, Na_pad)

    def head_mask(d, pad):
        lane = lax.broadcasted_iota(jnp.int32, (H, pad), 1)
        head = lax.broadcasted_iota(jnp.int32, (H, pad), 0)
        return jnp.where((lane >= head * d) & (lane < (head + 1) * d), 1.0, 0.0)

    maskP = head_mask(dP, padP)                                    # (H, padP)
    maskA = head_mask(dA, padA)                                    # (H, padA)

    def relation(Wh_src, a_srcT, a_dstT, adj, hmask):
        """Dense GAT aggregation for one edge type, all heads at once.

        Wh_src: (Ns, pad)  edge-type transform of source nodes (zero-padded lanes)
        a_srcT: (H, Ns)    folded src attention scores
        a_dstT: (H, Nd)    folded dst attention scores
        adj:    (Ns, Nd)   float {0,1} adjacency (src -> dst); padded rows/cols are 0
        hmask:  (H, pad)   {0,1} lane mask selecting head-h columns
        Returns (Nd, pad) aggregated features (zeros for dst nodes with no in-edges,
        matching DGL's fn.sum over zero messages).
        """
        Ns, pad = Wh_src.shape
        Nd = a_dstT.shape[1]
        # u_add_v edge scores for every head: (H, Ns, Nd)
        e = a_srcT[:, :, None] + a_dstT[:, None, :]
        e = jnp.where(e >= 0.0, e, NEG_SLOPE * e)                  # LeakyReLU
        e = e + ((adj - 1.0) * MASK_BIG)[None, :, :]               # mask non-edges (once)
        m = jnp.max(e, axis=1, keepdims=True)                      # (H, 1, Nd)
        p = jnp.exp(e - m) * adj[None, :, :]
        denom = jnp.maximum(jnp.sum(p, axis=1, keepdims=True), 1e-30)
        attn = p / denom                                           # exact edge_softmax
        # Stacked-K aggregation: one matmul for all heads.  Head-h lanes of the
        # result come only from the head-h slice of the stacked source features.
        src_stack = Wh_src[None, :, :] * hmask[:, None, :]         # (H, Ns, pad)
        ft = lax.dot_general(attn.reshape(H * Ns, Nd),
                             src_stack.reshape(H * Ns, pad),
                             (((0,), (0,)), ((), ())),
                             preferred_element_type=jnp.float32)   # (Nd, pad)
        return ft

    # Folded score columns, per relation / side.
    a_pp_src = scPT[0:H];          a_pa_src = scPT[H:2 * H]
    a_pp_dst = scPT[2 * H:3 * H];  a_ap_dst = scPT[3 * H:4 * H]
    a_ap_src = scAT[0:H];          a_aa_src = scAT[H:2 * H]
    a_pa_dst = scAT[2 * H:3 * H];  a_aa_dst = scAT[3 * H:4 * H]

    ft_pp = relation(Whp2p, a_pp_src, a_pp_dst, adj_pp_ref[...], maskP)
    ft_ap = relation(Wha2p, a_ap_src, a_ap_dst, adj_ap_ref[...], maskP)
    ft_pa = relation(Whp2a, a_pa_src, a_pa_dst, adj_pa_ref[...], maskA)
    ft_aa = relation(Wha2a, a_aa_src, a_aa_dst, adj_aa_ref[...], maskA)

    # use_relu=True; padded rows/lanes are all-zero on both sides -> full-width stores.
    hP_ref[...] = jnp.maximum(Whp + ft_pp + ft_ap, 0.0)
    hA_ref[...] = jnp.maximum(Wha + ft_pa + ft_aa, 0.0)


# ----------------------------------------------------------------------------- #
# Wrapper (weight fusion / padding done host-side, outside the kernel)
# ----------------------------------------------------------------------------- #
def _score_cols(W, b, p_flat, H, d):
    """Fold an attention vector p into a Linear (W, b): returns (in,H), (1,H) columns
    such that  x @ Wp + bp == sum_d ( (x @ W + b).reshape(H, d) * p.reshape(H, d) )."""
    Wp = (W * p_flat).reshape(W.shape[0], H, d).sum(axis=-1)
    bp = (b * p_flat).reshape(1, H, d).sum(axis=-1)
    return Wp, bp


def hetgat_forward(feat_P, feat_A, params, adjs, num_heads, out_dim):
    Np, in_P = feat_P.shape
    Na, in_A = feat_A.shape
    dP, dA = out_dim["P"], out_dim["A"]
    H = num_heads
    assert 4 * H <= SCORE_BLK, "score block assumes 4*num_heads <= 128"

    padP = _round_up(H * dP, 128)
    padA = _round_up(H * dA, 128)
    Np_pad = _round_up(Np, 8)
    Na_pad = _round_up(Na, 8)
    WP_tot, WA_tot, scP0, scA0 = _col_layout(padP, padA)
    bias_row = in_P + in_A
    K = _round_up(in_P + in_A + 1, 128)

    # ---- single fused, block-structured weight matrix ------------------------ #
    W_all = jnp.zeros((K, WP_tot + WA_tot), jnp.float32)

    def put(Wacc, Wsub, bsub, row0, col0):
        fi, fo = Wsub.shape
        Wacc = Wacc.at[row0:row0 + fi, col0:col0 + fo].set(Wsub)
        Wacc = Wacc.at[bias_row, col0:col0 + fo].set(bsub[0])
        return Wacc

    # P section (rows 0:in_P).
    W_all = put(W_all, params["W_P"],   params["b_P"],   0, 0)
    W_all = put(W_all, params["W_p2p"], params["b_p2p"], 0, padP)
    W_all = put(W_all, params["W_p2a"], params["b_p2a"], 0, 2 * padP)
    for idx, (wk, bk, pk, d) in enumerate((
            ("W_p2p", "b_p2p", "p2p_src", dP),
            ("W_p2a", "b_p2a", "p2a_src", dA),
            ("W_P",   "b_P",   "p2p_dst", dP),
            ("W_P",   "b_P",   "a2p_dst", dP))):
        Ws, bs = _score_cols(params[wk], params[bk], params[pk], H, d)
        W_all = put(W_all, Ws, bs, 0, scP0 + idx * H)

    # A section (rows in_P:in_P+in_A).
    base = WP_tot
    W_all = put(W_all, params["W_A"],   params["b_A"],   in_P, base)
    W_all = put(W_all, params["W_a2p"], params["b_a2p"], in_P, base + padA)
    W_all = put(W_all, params["W_a2a"], params["b_a2a"], in_P, base + padA + padP)
    for idx, (wk, bk, pk, d) in enumerate((
            ("W_a2p", "b_a2p", "a2p_src", dP),
            ("W_a2a", "b_a2a", "a2a_src", dA),
            ("W_A",   "b_A",   "p2a_dst", dA),
            ("W_A",   "b_A",   "a2a_dst", dA))):
        Ws, bs = _score_cols(params[wk], params[bk], params[pk], H, d)
        W_all = put(W_all, Ws, bs, in_P, scA0 + idx * H)

    # ---- stacked, row-padded node features with a constant-1 bias column ----- #
    feat_all = jnp.zeros((Np_pad + Na_pad, K), jnp.float32)
    feat_all = feat_all.at[:Np, :in_P].set(feat_P)
    feat_all = feat_all.at[:Np, bias_row].set(1.0)
    feat_all = feat_all.at[Np_pad:Np_pad + Na, in_P:in_P + in_A].set(feat_A)
    feat_all = feat_all.at[Np_pad:Np_pad + Na, bias_row].set(1.0)

    # ---- row/col padded adjacency (zero padding keeps padded nodes inert) ---- #
    def pad_adj(a, rp, cp):
        r, c = a.shape
        return jnp.zeros((rp, cp), jnp.float32).at[:r, :c].set(a)

    adj_pp = pad_adj(adjs["p2p"], Np_pad, Np_pad)
    adj_pa = pad_adj(adjs["p2a"], Np_pad, Na_pad)
    adj_ap = pad_adj(adjs["a2p"], Na_pad, Np_pad)
    adj_aa = pad_adj(adjs["a2a"], Na_pad, Na_pad)

    inputs = (feat_all, W_all, adj_pp, adj_pa, adj_ap, adj_aa)
    vmem = pltpu.MemorySpace.VMEM
    hP_pad, hA_pad = pl.pallas_call(
        functools.partial(hetgat_kernel, H, dP, dA, padP, padA, Np_pad, Na_pad),
        out_shape=(jax.ShapeDtypeStruct((Np_pad, padP), jnp.float32),
                   jax.ShapeDtypeStruct((Na_pad, padA), jnp.float32)),
        in_specs=[pl.BlockSpec(memory_space=vmem) for _ in inputs],
        out_specs=(pl.BlockSpec(memory_space=vmem),
                   pl.BlockSpec(memory_space=vmem)),
    )(*inputs)

    return {
        "P": hP_pad[:Np, :H * dP].reshape(Np, H, dP),
        "A": hA_pad[:Na, :H * dA].reshape(Na, H, dA),
    }


# ----------------------------------------------------------------------------- #
# Pure-JAX reference (mirrors DGL semantics) for a correctness check.
# ----------------------------------------------------------------------------- #
def reference_forward(feat_P, feat_A, params, adjs, num_heads, out_dim):
    dP, dA = out_dim["P"], out_dim["A"]
    hi = lax.Precision.HIGHEST

    def lin(x, W, b):
        return jnp.dot(x, W, precision=hi) + b

    def view3(x, d):
        return x.reshape(x.shape[0], num_heads, d)

    Whp = view3(lin(feat_P, params["W_P"], params["b_P"]), dP)
    Wha = view3(lin(feat_A, params["W_A"], params["b_A"]), dA)
    Whp2p = view3(lin(feat_P, params["W_p2p"], params["b_p2p"]), dP)
    Whp2a = view3(lin(feat_P, params["W_p2a"], params["b_p2a"]), dA)
    Wha2p = view3(lin(feat_A, params["W_a2p"], params["b_a2p"]), dP)
    Wha2a = view3(lin(feat_A, params["W_a2a"], params["b_a2a"]), dA)

    def relation(Wh_src, Wh_dst, p_src, p_dst, adj, d):
        ps = p_src.reshape(1, num_heads, d)
        pd = p_dst.reshape(1, num_heads, d)
        a_src = (Wh_src * ps).sum(-1)                       # (Ns, H)
        a_dst = (Wh_dst * pd).sum(-1)                       # (Nd, H)
        e = a_src[:, None, :] + a_dst[None, :, :]           # (Ns, Nd, H)
        e = jnp.where(e >= 0.0, e, NEG_SLOPE * e)
        mask = adj[:, :, None]
        e = jnp.where(mask > 0.0, e, -MASK_BIG)
        m = jnp.max(e, axis=0, keepdims=True)
        p = jnp.exp(e - m) * mask
        denom = jnp.sum(p, axis=0, keepdims=True)
        attn = p / jnp.maximum(denom, 1e-30)
        ft = jnp.einsum("svh,shd->vhd", attn, Wh_src, precision=hi)
        return ft

    ft_pp = relation(Whp2p, Whp, params["p2p_src"], params["p2p_dst"], adjs["p2p"], dP)
    ft_ap = relation(Wha2p, Whp, params["a2p_src"], params["a2p_dst"], adjs["a2p"], dP)
    ft_pa = relation(Whp2a, Wha, params["p2a_src"], params["p2a_dst"], adjs["p2a"], dA)
    ft_aa = relation(Wha2a, Wha, params["a2a_src"], params["a2a_dst"], adjs["a2a"], dA)

    hP = jax.nn.relu(Whp + ft_pp + ft_ap)
    hA = jax.nn.relu(Wha + ft_pa + ft_aa)
    return {"P": hP, "A": hA}


# ----------------------------------------------------------------------------- #
# Deterministic parameter init (synthetic; mimics the module's init scheme).
# ----------------------------------------------------------------------------- #
def init_params(key, in_dim, out_dim, num_heads):
    gain = math.sqrt(2.0)  # nn.init.calculate_gain('relu')
    params = {}
    keys = jax.random.split(key, 32)
    ki = iter(range(32))

    def linear(kw, kb, fan_in, fan_out):
        bound = 1.0 / math.sqrt(fan_in)
        W = jax.random.uniform(kw, (fan_in, fan_out), jnp.float32, -bound, bound)
        b = jax.random.uniform(kb, (1, fan_out), jnp.float32, -bound, bound)
        return W, b

    specs = {
        "P":   (in_dim["P"], out_dim["P"] * num_heads),
        "A":   (in_dim["A"], out_dim["A"] * num_heads),
        "p2p": (in_dim["P"], out_dim["P"] * num_heads),
        "p2a": (in_dim["P"], out_dim["A"] * num_heads),
        "a2p": (in_dim["A"], out_dim["P"] * num_heads),
        "a2a": (in_dim["A"], out_dim["A"] * num_heads),
    }
    for name, (fi, fo) in specs.items():
        W, b = linear(keys[next(ki)], keys[next(ki)], fi, fo)
        params[f"W_{name}"] = W
        params[f"b_{name}"] = b

    for name, d in (("p2p", out_dim["P"]), ("p2a", out_dim["A"]),
                    ("a2p", out_dim["P"]), ("a2a", out_dim["A"])):
        fan_in = num_heads * d
        fan_out = d
        std = gain * math.sqrt(2.0 / (fan_in + fan_out))
        params[f"{name}_src"] = std * jax.random.normal(
            keys[next(ki)], (1, num_heads * d), jnp.float32)
        params[f"{name}_dst"] = std * jax.random.normal(
            keys[next(ki)], (1, num_heads * d), jnp.float32)
    return params


if __name__ == "__main__":
    # Small shapes consistent with the module.
    in_dim = {"P": 16, "A": 12}
    out_dim = {"P": 8, "A": 6}
    num_heads = 4
    Np, Na = 6, 3

    key = jax.random.PRNGKey(0)
    k_feat_p, k_feat_a, k_adj, k_params = jax.random.split(key, 4)

    feat_P = jax.random.normal(k_feat_p, (Np, in_dim["P"]), jnp.float32)
    feat_A = jax.random.normal(k_feat_a, (Na, in_dim["A"]), jnp.float32)

    ka = jax.random.split(k_adj, 4)
    adjs = {
        "p2p": (jax.random.uniform(ka[0], (Np, Np)) > 0.4).astype(jnp.float32),
        "p2a": (jax.random.uniform(ka[1], (Np, Na)) > 0.4).astype(jnp.float32),
        "a2p": (jax.random.uniform(ka[2], (Na, Np)) > 0.4).astype(jnp.float32),
        "a2a": (jax.random.uniform(ka[3], (Na, Na)) > 0.4).astype(jnp.float32),
    }

    params = init_params(k_params, in_dim, out_dim, num_heads)

    out = hetgat_forward(feat_P, feat_A, params, adjs, num_heads, out_dim)
    out = jax.block_until_ready(out)

    ref = reference_forward(feat_P, feat_A, params, adjs, num_heads, out_dim)
    assert out["P"].shape == (Np, num_heads, out_dim["P"])
    assert out["A"].shape == (Na, num_heads, out_dim["A"])
    assert jnp.allclose(out["P"], ref["P"], atol=1e-3, rtol=1e-3)
    assert jnp.allclose(out["A"], ref["A"], atol=1e-3, rtol=1e-3)

    print("KERNEL_OK")
</pallas_src>

<mosaic_0001>
module attributes {stable_mosaic.version = 11 : i64} {
  func.func @hetgat_kernel(%arg0: memref<16x128xf32, #tpu.memory_space<vmem>>, %arg1: memref<128x1024xf32, #tpu.memory_space<vmem>>, %arg2: memref<8x8xf32, #tpu.memory_space<vmem>>, %arg3: memref<8x8xf32, #tpu.memory_space<vmem>>, %arg4: memref<8x8xf32, #tpu.memory_space<vmem>>, %arg5: memref<8x8xf32, #tpu.memory_space<vmem>>, %arg6: memref<8x128xf32, #tpu.memory_space<vmem>>, %arg7: memref<8x128xf32, #tpu.memory_space<vmem>>) attributes {dimension_semantics = [], scalar_prefetch = 0 : i64, scratch_operands = 0 : i64, tpu.core_type = #tpu.core_type<tc>} {
    %c0 = arith.constant 0 : index
    %c0_0 = arith.constant 0 : index
    %0 = vector.load %arg0[%c0, %c0_0] : memref<16x128xf32, #tpu.memory_space<vmem>>, vector<16x128xf32>
    %c0_1 = arith.constant 0 : index
    %c0_2 = arith.constant 0 : index
    %1 = vector.load %arg1[%c0_1, %c0_2] : memref<128x1024xf32, #tpu.memory_space<vmem>>, vector<128x1024xf32>
    %cst = arith.constant dense<0.000000e+00> : vector<16x1024xf32>
    %2 = tpu.matmul %0, %1, %cst {dimension_numbers = #tpu.dot_dimension_numbers<[1], [0], [0], [1], [0, 0, 1, 1], [], []>} : vector<16x128xf32>, vector<128x1024xf32>, vector<16x1024xf32> -> vector<16x1024xf32>
    %3 = vector.extract_strided_slice %2 {offsets = [0, 0], sizes = [8, 128], strides = [1, 1]} : vector<16x1024xf32> to vector<8x128xf32>
    %4 = vector.extract_strided_slice %2 {offsets = [0, 128], sizes = [8, 128], strides = [1, 1]} : vector<16x1024xf32> to vector<8x128xf32>
    %5 = vector.extract_strided_slice %2 {offsets = [0, 256], sizes = [8, 128], strides = [1, 1]} : vector<16x1024xf32> to vector<8x128xf32>
    %6 = vector.extract_strided_slice %2 {offsets = [0, 384], sizes = [8, 128], strides = [1, 1]} : vector<16x1024xf32> to vector<8x128xf32>
    %7 = vector.extract_strided_slice %2 {offsets = [8, 512], sizes = [8, 128], strides = [1, 1]} : vector<16x1024xf32> to vector<8x128xf32>
    %8 = vector.extract_strided_slice %2 {offsets = [8, 640], sizes = [8, 128], strides = [1, 1]} : vector<16x1024xf32> to vector<8x128xf32>
    %9 = vector.extract_strided_slice %2 {offsets = [8, 768], sizes = [8, 128], strides = [1, 1]} : vector<16x1024xf32> to vector<8x128xf32>
    %10 = vector.extract_strided_slice %2 {offsets = [8, 896], sizes = [8, 128], strides = [1, 1]} : vector<16x1024xf32> to vector<8x128xf32>
    %11 = tpu.transpose %6, [1, 0] : vector<8x128xf32> -> vector<128x8xf32>
    %12 = tpu.transpose %10, [1, 0] : vector<8x128xf32> -> vector<128x8xf32>
    %13 = tpu.iota {dimensions = array<i32: 1>} : vector<4x128xi32>
    %14 = tpu.iota {dimensions = array<i32: 0>} : vector<4x128xi32>
    %c8_i32 = arith.constant 8 : i32
    %15 = vector.broadcast %c8_i32 : i32 to vector<4x128xi32>
    %16 = arith.muli %14, %15 : vector<4x128xi32>
    %17 = arith.cmpi sge, %13, %16 : vector<4x128xi32>
    %c1_i32 = arith.constant 1 : i32
    %18 = vector.broadcast %c1_i32 : i32 to vector<4x128xi32>
    %19 = arith.addi %14, %18 : vector<4x128xi32>
    %c8_i32_3 = arith.constant 8 : i32
    %20 = vector.broadcast %c8_i32_3 : i32 to vector<4x128xi32>
    %21 = arith.muli %19, %20 : vector<4x128xi32>
    %22 = arith.cmpi slt, %13, %21 : vector<4x128xi32>
    %23 = arith.andi %17, %22 : vector<4x128xi1>
    %cst_4 = arith.constant 1.000000e+00 : f32
    %cst_5 = arith.constant 0.000000e+00 : f32
    %24 = vector.broadcast %cst_4 : f32 to vector<4x128xf32>
    %25 = vector.broadcast %cst_5 : f32 to vector<4x128xf32>
    %26 = arith.select %23, %24, %25 : vector<4x128xi1>, vector<4x128xf32>
    %27 = tpu.iota {dimensions = array<i32: 1>} : vector<4x128xi32>
    %28 = tpu.iota {dimensions = array<i32: 0>} : vector<4x128xi32>
    %c6_i32 = arith.constant 6 : i32
    %29 = vector.broadcast %c6_i32 : i32 to vector<4x128xi32>
    %30 = arith.muli %28, %29 : vector<4x128xi32>
    %31 = arith.cmpi sge, %27, %30 : vector<4x128xi32>
    %c1_i32_6 = arith.constant 1 : i32
    %32 = vector.broadcast %c1_i32_6 : i32 to vector<4x128xi32>
    %33 = arith.addi %28, %32 : vector<4x128xi32>
    %c6_i32_7 = arith.constant 6 : i32
    %34 = vector.broadcast %c6_i32_7 : i32 to vector<4x128xi32>
    %35 = arith.muli %33, %34 : vector<4x128xi32>
    %36 = arith.cmpi slt, %27, %35 : vector<4x128xi32>
    %37 = arith.andi %31, %36 : vector<4x128xi1>
    %cst_8 = arith.constant 1.000000e+00 : f32
    %cst_9 = arith.constant 0.000000e+00 : f32
    %38 = vector.broadcast %cst_8 : f32 to vector<4x128xf32>
    %39 = vector.broadcast %cst_9 : f32 to vector<4x128xf32>
    %40 = arith.select %37, %38, %39 : vector<4x128xi1>, vector<4x128xf32>
    %41 = vector.extract_strided_slice %11 {offsets = [0, 0], sizes = [4, 8], strides = [1, 1]} : vector<128x8xf32> to vector<4x8xf32>
    %42 = vector.extract_strided_slice %11 {offsets = [4, 0], sizes = [4, 8], strides = [1, 1]} : vector<128x8xf32> to vector<4x8xf32>
    %43 = vector.extract_strided_slice %11 {offsets = [8, 0], sizes = [4, 8], strides = [1, 1]} : vector<128x8xf32> to vector<4x8xf32>
    %44 = vector.extract_strided_slice %11 {offsets = [12, 0], sizes = [4, 8], strides = [1, 1]} : vector<128x8xf32> to vector<4x8xf32>
    %45 = vector.extract_strided_slice %12 {offsets = [0, 0], sizes = [4, 8], strides = [1, 1]} : vector<128x8xf32> to vector<4x8xf32>
    %46 = vector.extract_strided_slice %12 {offsets = [4, 0], sizes = [4, 8], strides = [1, 1]} : vector<128x8xf32> to vector<4x8xf32>
    %47 = vector.extract_strided_slice %12 {offsets = [8, 0], sizes = [4, 8], strides = [1, 1]} : vector<128x8xf32> to vector<4x8xf32>
    %48 = vector.extract_strided_slice %12 {offsets = [12, 0], sizes = [4, 8], strides = [1, 1]} : vector<128x8xf32> to vector<4x8xf32>
    %c0_10 = arith.constant 0 : index
    %c0_11 = arith.constant 0 : index
    %49 = vector.load %arg2[%c0_10, %c0_11] : memref<8x8xf32, #tpu.memory_space<vmem>>, vector<8x8xf32>
    %50 = vector.shape_cast %41 : vector<4x8xf32> to vector<4x8x1xf32>
    %51 = vector.shape_cast %43 : vector<4x8xf32> to vector<4x1x8xf32>
    %52 = vector.broadcast %50 : vector<4x8x1xf32> to vector<4x8x8xf32>
    %53 = vector.broadcast %51 : vector<4x1x8xf32> to vector<4x8x8xf32>
    %54 = arith.addf %52, %53 : vector<4x8x8xf32>
    %cst_12 = arith.constant 0.000000e+00 : f32
    %55 = vector.broadcast %cst_12 : f32 to vector<4x8x8xf32>
    %56 = arith.cmpf oge, %54, %55 : vector<4x8x8xf32>
    %cst_13 = arith.constant 2.000000e-01 : f32
    %57 = vector.broadcast %cst_13 : f32 to vector<4x8x8xf32>
    %58 = arith.mulf %57, %54 : vector<4x8x8xf32>
    %59 = arith.select %56, %54, %58 : vector<4x8x8xi1>, vector<4x8x8xf32>
    %cst_14 = arith.constant 1.000000e+00 : f32
    %60 = vector.broadcast %cst_14 : f32 to vector<8x8xf32>
    %61 = arith.subf %49, %60 : vector<8x8xf32>
    %cst_15 = arith.constant 1.000000e+30 : f32
    %62 = vector.broadcast %cst_15 : f32 to vector<8x8xf32>
    %63 = arith.mulf %61, %62 : vector<8x8xf32>
    %64 = vector.shape_cast %63 : vector<8x8xf32> to vector<1x8x8xf32>
    %65 = vector.broadcast %64 : vector<1x8x8xf32> to vector<4x8x8xf32>
    %66 = arith.addf %59, %65 : vector<4x8x8xf32>
    %cst_16 = arith.constant dense<0xFF800000> : vector<4x8xf32>
    %67 = vector.multi_reduction <maximumf>, %66, %cst_16 [1] : vector<4x8x8xf32> to vector<4x8xf32>
    %68 = vector.shape_cast %67 : vector<4x8xf32> to vector<4x1x8xf32>
    %69 = vector.broadcast %68 : vector<4x1x8xf32> to vector<4x8x8xf32>
    %70 = arith.subf %66, %69 : vector<4x8x8xf32>
    %71 = math.exp %70 : vector<4x8x8xf32>
    %72 = vector.shape_cast %49 : vector<8x8xf32> to vector<1x8x8xf32>
    %73 = vector.broadcast %72 : vector<1x8x8xf32> to vector<4x8x8xf32>
    %74 = arith.mulf %71, %73 : vector<4x8x8xf32>
    %cst_17 = arith.constant dense<0.000000e+00> : vector<4x8xf32>
    %75 = vector.multi_reduction <add>, %74, %cst_17 [1] : vector<4x8x8xf32> to vector<4x8xf32>
    %76 = vector.shape_cast %75 : vector<4x8xf32> to vector<4x1x8xf32>
    %cst_18 = arith.constant 1.000000e-30 : f32
    %77 = vector.broadcast %cst_18 : f32 to vector<4x1x8xf32>
    %78 = arith.maximumf %76, %77 : vector<4x1x8xf32>
    %79 = vector.broadcast %78 : vector<4x1x8xf32> to vector<4x8x8xf32>
    %80 = arith.divf %74, %79 : vector<4x8x8xf32>
    %81 = vector.shape_cast %4 : vector<8x128xf32> to vector<1x8x128xf32>
    %82 = vector.shape_cast %26 : vector<4x128xf32> to vector<4x1x128xf32>
    %83 = vector.broadcast %81 : vector<1x8x128xf32> to vector<4x8x128xf32>
    %84 = vector.broadcast %82 : vector<4x1x128xf32> to vector<4x8x128xf32>
    %85 = arith.mulf %83, %84 : vector<4x8x128xf32>
    %86 = vector.shape_cast %80 : vector<4x8x8xf32> to vector<32x8xf32>
    %87 = vector.shape_cast %85 : vector<4x8x128xf32> to vector<32x128xf32>
    %cst_19 = arith.constant dense<0.000000e+00> : vector<8x128xf32>
    %88 = tpu.matmul %86, %87, %cst_19 {dimension_numbers = #tpu.dot_dimension_numbers<[0], [0], [1], [1], [0, 1, 1, 1], [], []>} : vector<32x8xf32>, vector<32x128xf32>, vector<8x128xf32> -> vector<8x128xf32>
    %c0_20 = arith.constant 0 : index
    %c0_21 = arith.constant 0 : index
    %89 = vector.load %arg4[%c0_20, %c0_21] : memref<8x8xf32, #tpu.memory_space<vmem>>, vector<8x8xf32>
    %90 = vector.shape_cast %45 : vector<4x8xf32> to vector<4x8x1xf32>
    %91 = vector.shape_cast %44 : vector<4x8xf32> to vector<4x1x8xf32>
    %92 = vector.broadcast %90 : vector<4x8x1xf32> to vector<4x8x8xf32>
    %93 = vector.broadcast %91 : vector<4x1x8xf32> to vector<4x8x8xf32>
    %94 = arith.addf %92, %93 : vector<4x8x8xf32>
    %cst_22 = arith.constant 0.000000e+00 : f32
    %95 = vector.broadcast %cst_22 : f32 to vector<4x8x8xf32>
    %96 = arith.cmpf oge, %94, %95 : vector<4x8x8xf32>
    %cst_23 = arith.constant 2.000000e-01 : f32
    %97 = vector.broadcast %cst_23 : f32 to vector<4x8x8xf32>
    %98 = arith.mulf %97, %94 : vector<4x8x8xf32>
    %99 = arith.select %96, %94, %98 : vector<4x8x8xi1>, vector<4x8x8xf32>
    %cst_24 = arith.constant 1.000000e+00 : f32
    %100 = vector.broadcast %cst_24 : f32 to vector<8x8xf32>
    %101 = arith.subf %89, %100 : vector<8x8xf32>
    %cst_25 = arith.constant 1.000000e+30 : f32
    %102 = vector.broadcast %cst_25 : f32 to vector<8x8xf32>
    %103 = arith.mulf %101, %102 : vector<8x8xf32>
    %104 = vector.shape_cast %103 : vector<8x8xf32> to vector<1x8x8xf32>
    %105 = vector.broadcast %104 : vector<1x8x8xf32> to vector<4x8x8xf32>
    %106 = arith.addf %99, %105 : vector<4x8x8xf32>
    %cst_26 = arith.constant dense<0xFF800000> : vector<4x8xf32>
    %107 = vector.multi_reduction <maximumf>, %106, %cst_26 [1] : vector<4x8x8xf32> to vector<4x8xf32>
    %108 = vector.shape_cast %107 : vector<4x8xf32> to vector<4x1x8xf32>
    %109 = vector.broadcast %108 : vector<4x1x8xf32> to vector<4x8x8xf32>
    %110 = arith.subf %106, %109 : vector<4x8x8xf32>
    %111 = math.exp %110 : vector<4x8x8xf32>
    %112 = vector.shape_cast %89 : vector<8x8xf32> to vector<1x8x8xf32>
    %113 = vector.broadcast %112 : vector<1x8x8xf32> to vector<4x8x8xf32>
    %114 = arith.mulf %111, %113 : vector<4x8x8xf32>
    %cst_27 = arith.constant dense<0.000000e+00> : vector<4x8xf32>
    %115 = vector.multi_reduction <add>, %114, %cst_27 [1] : vector<4x8x8xf32> to vector<4x8xf32>
    %116 = vector.shape_cast %115 : vector<4x8xf32> to vector<4x1x8xf32>
    %cst_28 = arith.constant 1.000000e-30 : f32
    %117 = vector.broadcast %cst_28 : f32 to vector<4x1x8xf32>
    %118 = arith.maximumf %116, %117 : vector<4x1x8xf32>
    %119 = vector.broadcast %118 : vector<4x1x8xf32> to vector<4x8x8xf32>
    %120 = arith.divf %114, %119 : vector<4x8x8xf32>
    %121 = vector.shape_cast %8 : vector<8x128xf32> to vector<1x8x128xf32>
    %122 = vector.shape_cast %26 : vector<4x128xf32> to vector<4x1x128xf32>
    %123 = vector.broadcast %121 : vector<1x8x128xf32> to vector<4x8x128xf32>
    %124 = vector.broadcast %122 : vector<4x1x128xf32> to vector<4x8x128xf32>
    %125 = arith.mulf %123, %124 : vector<4x8x128xf32>
    %126 = vector.shape_cast %120 : vector<4x8x8xf32> to vector<32x8xf32>
    %127 = vector.shape_cast %125 : vector<4x8x128xf32> to vector<32x128xf32>
    %cst_29 = arith.constant dense<0.000000e+00> : vector<8x128xf32>
    %128 = tpu.matmul %126, %127, %cst_29 {dimension_numbers = #tpu.dot_dimension_numbers<[0], [0], [1], [1], [0, 1, 1, 1], [], []>} : vector<32x8xf32>, vector<32x128xf32>, vector<8x128xf32> -> vector<8x128xf32>
    %c0_30 = arith.constant 0 : index
    %c0_31 = arith.constant 0 : index
    %129 = vector.load %arg3[%c0_30, %c0_31] : memref<8x8xf32, #tpu.memory_space<vmem>>, vector<8x8xf32>
    %130 = vector.shape_cast %42 : vector<4x8xf32> to vector<4x8x1xf32>
    %131 = vector.shape_cast %47 : vector<4x8xf32> to vector<4x1x8xf32>
    %132 = vector.broadcast %130 : vector<4x8x1xf32> to vector<4x8x8xf32>
    %133 = vector.broadcast %131 : vector<4x1x8xf32> to vector<4x8x8xf32>
    %134 = arith.addf %132, %133 : vector<4x8x8xf32>
    %cst_32 = arith.constant 0.000000e+00 : f32
    %135 = vector.broadcast %cst_32 : f32 to vector<4x8x8xf32>
    %136 = arith.cmpf oge, %134, %135 : vector<4x8x8xf32>
    %cst_33 = arith.constant 2.000000e-01 : f32
    %137 = vector.broadcast %cst_33 : f32 to vector<4x8x8xf32>
    %138 = arith.mulf %137, %134 : vector<4x8x8xf32>
    %139 = arith.select %136, %134, %138 : vector<4x8x8xi1>, vector<4x8x8xf32>
    %cst_34 = arith.constant 1.000000e+00 : f32
    %140 = vector.broadcast %cst_34 : f32 to vector<8x8xf32>
    %141 = arith.subf %129, %140 : vector<8x8xf32>
    %cst_35 = arith.constant 1.000000e+30 : f32
    %142 = vector.broadcast %cst_35 : f32 to vector<8x8xf32>
    %143 = arith.mulf %141, %142 : vector<8x8xf32>
    %144 = vector.shape_cast %143 : vector<8x8xf32> to vector<1x8x8xf32>
    %145 = vector.broadcast %144 : vector<1x8x8xf32> to vector<4x8x8xf32>
    %146 = arith.addf %139, %145 : vector<4x8x8xf32>
    %cst_36 = arith.constant dense<0xFF800000> : vector<4x8xf32>
    %147 = vector.multi_reduction <maximumf>, %146, %cst_36 [1] : vector<4x8x8xf32> to vector<4x8xf32>
    %148 = vector.shape_cast %147 : vector<4x8xf32> to vector<4x1x8xf32>
    %149 = vector.broadcast %148 : vector<4x1x8xf32> to vector<4x8x8xf32>
    %150 = arith.subf %146, %149 : vector<4x8x8xf32>
    %151 = math.exp %150 : vector<4x8x8xf32>
    %152 = vector.shape_cast %129 : vector<8x8xf32> to vector<1x8x8xf32>
    %153 = vector.broadcast %152 : vector<1x8x8xf32> to vector<4x8x8xf32>
    %154 = arith.mulf %151, %153 : vector<4x8x8xf32>
    %cst_37 = arith.constant dense<0.000000e+00> : vector<4x8xf32>
    %155 = vector.multi_reduction <add>, %154, %cst_37 [1] : vector<4x8x8xf32> to vector<4x8xf32>
    %156 = vector.shape_cast %155 : vector<4x8xf32> to vector<4x1x8xf32>
    %cst_38 = arith.constant 1.000000e-30 : f32
    %157 = vector.broadcast %cst_38 : f32 to vector<4x1x8xf32>
    %158 = arith.maximumf %156, %157 : vector<4x1x8xf32>
    %159 = vector.broadcast %158 : vector<4x1x8xf32> to vector<4x8x8xf32>
    %160 = arith.divf %154, %159 : vector<4x8x8xf32>
    %161 = vector.shape_cast %5 : vector<8x128xf32> to vector<1x8x128xf32>
    %162 = vector.shape_cast %40 : vector<4x128xf32> to vector<4x1x128xf32>
    %163 = vector.broadcast %161 : vector<1x8x128xf32> to vector<4x8x128xf32>
    %164 = vector.broadcast %162 : vector<4x1x128xf32> to vector<4x8x128xf32>
    %165 = arith.mulf %163, %164 : vector<4x8x128xf32>
    %166 = vector.shape_cast %160 : vector<4x8x8xf32> to vector<32x8xf32>
    %167 = vector.shape_cast %165 : vector<4x8x128xf32> to vector<32x128xf32>
    %cst_39 = arith.constant dense<0.000000e+00> : vector<8x128xf32>
    %168 = tpu.matmul %166, %167, %cst_39 {dimension_numbers = #tpu.dot_dimension_numbers<[0], [0], [1], [1], [0, 1, 1, 1], [], []>} : vector<32x8xf32>, vector<32x128xf32>, vector<8x128xf32> -> vector<8x128xf32>
    %c0_40 = arith.constant 0 : index
    %c0_41 = arith.constant 0 : index
    %169 = vector.load %arg5[%c0_40, %c0_41] : memref<8x8xf32, #tpu.memory_space<vmem>>, vector<8x8xf32>
    %170 = vector.shape_cast %46 : vector<4x8xf32> to vector<4x8x1xf32>
    %171 = vector.shape_cast %48 : vector<4x8xf32> to vector<4x1x8xf32>
    %172 = vector.broadcast %170 : vector<4x8x1xf32> to vector<4x8x8xf32>
    %173 = vector.broadcast %171 : vector<4x1x8xf32> to vector<4x8x8xf32>
    %174 = arith.addf %172, %173 : vector<4x8x8xf32>
    %cst_42 = arith.constant 0.000000e+00 : f32
    %175 = vector.broadcast %cst_42 : f32 to vector<4x8x8xf32>
    %176 = arith.cmpf oge, %174, %175 : vector<4x8x8xf32>
    %cst_43 = arith.constant 2.000000e-01 : f32
    %177 = vector.broadcast %cst_43 : f32 to vector<4x8x8xf32>
    %178 = arith.mulf %177, %174 : vector<4x8x8xf32>
    %179 = arith.select %176, %174, %178 : vector<4x8x8xi1>, vector<4x8x8xf32>
    %cst_44 = arith.constant 1.000000e+00 : f32
    %180 = vector.broadcast %cst_44 : f32 to vector<8x8xf32>
    %181 = arith.subf %169, %180 : vector<8x8xf32>
    %cst_45 = arith.constant 1.000000e+30 : f32
    %182 = vector.broadcast %cst_45 : f32 to vector<8x8xf32>
    %183 = arith.mulf %181, %182 : vector<8x8xf32>
    %184 = vector.shape_cast %183 : vector<8x8xf32> to vector<1x8x8xf32>
    %185 = vector.broadcast %184 : vector<1x8x8xf32> to vector<4x8x8xf32>
    %186 = arith.addf %179, %185 : vector<4x8x8xf32>
    %cst_46 = arith.constant dense<0xFF800000> : vector<4x8xf32>
    %187 = vector.multi_reduction <maximumf>, %186, %cst_46 [1] : vector<4x8x8xf32> to vector<4x8xf32>
    %188 = vector.shape_cast %187 : vector<4x8xf32> to vector<4x1x8xf32>
    %189 = vector.broadcast %188 : vector<4x1x8xf32> to vector<4x8x8xf32>
    %190 = arith.subf %186, %189 : vector<4x8x8xf32>
    %191 = math.exp %190 : vector<4x8x8xf32>
    %192 = vector.shape_cast %169 : vector<8x8xf32> to vector<1x8x8xf32>
    %193 = vector.broadcast %192 : vector<1x8x8xf32> to vector<4x8x8xf32>
    %194 = arith.mulf %191, %193 : vector<4x8x8xf32>
    %cst_47 = arith.constant dense<0.000000e+00> : vector<4x8xf32>
    %195 = vector.multi_reduction <add>, %194, %cst_47 [1] : vector<4x8x8xf32> to vector<4x8xf32>
    %196 = vector.shape_cast %195 : vector<4x8xf32> to vector<4x1x8xf32>
    %cst_48 = arith.constant 1.000000e-30 : f32
    %197 = vector.broadcast %cst_48 : f32 to vector<4x1x8xf32>
    %198 = arith.maximumf %196, %197 : vector<4x1x8xf32>
    %199 = vector.broadcast %198 : vector<4x1x8xf32> to vector<4x8x8xf32>
    %200 = arith.divf %194, %199 : vector<4x8x8xf32>
    %201 = vector.shape_cast %9 : vector<8x128xf32> to vector<1x8x128xf32>
    %202 = vector.shape_cast %40 : vector<4x128xf32> to vector<4x1x128xf32>
    %203 = vector.broadcast %201 : vector<1x8x128xf32> to vector<4x8x128xf32>
    %204 = vector.broadcast %202 : vector<4x1x128xf32> to vector<4x8x128xf32>
    %205 = arith.mulf %203, %204 : vector<4x8x128xf32>
    %206 = vector.shape_cast %200 : vector<4x8x8xf32> to vector<32x8xf32>
    %207 = vector.shape_cast %205 : vector<4x8x128xf32> to vector<32x128xf32>
    %cst_49 = arith.constant dense<0.000000e+00> : vector<8x128xf32>
    %208 = tpu.matmul %206, %207, %cst_49 {dimension_numbers = #tpu.dot_dimension_numbers<[0], [0], [1], [1], [0, 1, 1, 1], [], []>} : vector<32x8xf32>, vector<32x128xf32>, vector<8x128xf32> -> vector<8x128xf32>
    %209 = arith.addf %3, %88 : vector<8x128xf32>
    %210 = arith.addf %209, %128 : vector<8x128xf32>
    %cst_50 = arith.constant 0.000000e+00 : f32
    %211 = vector.broadcast %cst_50 : f32 to vector<8x128xf32>
    %212 = arith.maximumf %210, %211 : vector<8x128xf32>
    %c0_51 = arith.constant 0 : index
    %c0_52 = arith.constant 0 : index
    %213 = vector.load %arg6[%c0_51, %c0_52] : memref<8x128xf32, #tpu.memory_space<vmem>>, vector<8x128xf32>
    tpu.vector_store %arg6[%c0_51, %c0_52], %212 {strides = array<i32>} : memref<8x128xf32, #tpu.memory_space<vmem>>, vector<8x128xf32>,
    %214 = arith.addf %7, %168 : vector<8x128xf32>
    %215 = arith.addf %214, %208 : vector<8x128xf32>
    %cst_53 = arith.constant 0.000000e+00 : f32
    %216 = vector.broadcast %cst_53 : f32 to vector<8x128xf32>
    %217 = arith.maximumf %215, %216 : vector<8x128xf32>
    %c0_54 = arith.constant 0 : index
    %c0_55 = arith.constant 0 : index
    %218 = vector.load %arg7[%c0_54, %c0_55] : memref<8x128xf32, #tpu.memory_space<vmem>>, vector<8x128xf32>
    tpu.vector_store %arg7[%c0_54, %c0_55], %217 {strides = array<i32>} : memref<8x128xf32, #tpu.memory_space<vmem>>, vector<8x128xf32>,
    return
  }
}

</mosaic_0001>

<bundles_post_ra>
// kernel: tpu_custom_call.1
= control target key start
LH: loop header
LB: loop body
LE: loop exit
PB: predicated region body
PF: predicated region fallthrough
CT: control target
= control target key end

     0   :  { %13 = vsyncpa [#allocation3], 0  ;;  %s2909_s0 = inlined_call_operand.hbm [shape: f32[16,128], index: 0, kind: input, shape index: {}]   ;;  %s2910_s1 = inlined_call_operand.hbm [shape: f32[128,1024], index: 1, kind: input, shape index: {}]   ;;  %s2911_s2 = inlined_call_operand.hbm [shape: f32[8,8], index: 2, kind: input, shape index: {}]   ;;  %s2912_s3 = inlined_call_operand.vmem [shape: f32[8,8], index: 3, kind: input, shape index: {}]   ;;  %s2913_s4 = inlined_call_operand.hbm [shape: f32[8,8], index: 4, kind: input, shape index: {}]   ;;  %s2914_s5 = inlined_call_operand.vmem [shape: f32[8,8], index: 5, kind: input, shape index: {}]   ;;  %s2915_s6 = inlined_call_operand.hbm [shape: f32[8,128], index: 6, kind: output, shape index: {0}]   ;;  %s2916_s7 = inlined_call_operand.hbm [shape: f32[8,128], index: 7, kind: output, shape index: {1}]  }
   0x1   :  { %14 = vsyncpa [#allocation6], 0 }
   0x2   :  { %15 = vsyncpa [#allocation9], 0 }
   0x3   :  { %16 = vsyncpa [#allocation4], 0 }
   0x4   :  { %17 = vsyncpa [#allocation12], 0  ;;  %s2320_s24 = smov [#allocation5]   ;;  %s2178_s28 = scalar_lea.hbm %s2910_s1, 16384 }
   0x5   :  { %s35_s25 = sshll.u32 %s2320_s24, 4  ;;  %p2179_p0 = scmp.ne.s32.totalorder %s2910_s1, %s2178_s28  ;;  %s36_s25 = int_to_ptr.vmem [resolvable:$true] %s35_s25 }
   0x6   :  { %p2182_p1 = scmp.lt.u32.totalorder %s2178_s28, %s2910_s1 }
   0x8   :  { %p2184_p2 = pnand %p2182_p1, %p2179_p0 }
   0xa   :  { %2187 = shalt.err (!%p2184_p2)
}
   0xb   :  { %s2188_s10 = scalar_lea.vmem %s36_s25, 16384  ;;  %p2193_p4 = scmp.lt.s32.totalorder %s36_s25, %s36_s25 }
   0xc   :  { %p2189_p3 = scmp.ne.s32.totalorder %s36_s25, %s2188_s10  ;;  %p2194_p5 = scmp.lt.s32.totalorder %s2188_s10, %s2188_s10 }
   0xe   :  { %p2195_p6 = por %p2194_p5, %p2193_p4 }
  0x10   :  { %p2196_p7 = pnand %p2195_p6, %p2189_p3 }
  0x12   :  { %2199 = shalt.err (!%p2196_p7)
}
  0x13   :  { %s2321_s11 = smov 1024   ;;  %s2322_s12 = smov 64  }
  0x14   :  { %41 = dma.hbm_to_vmem [thread:$0]  %s2910_s1, 16384, %s36_s25, [#allocation6], %s2321_s11, %s2321_s11, %s2322_s12  }
  0x15   :  { %s2323_s15 = smov [#allocation2]   ;;  %s2200_s19 = scalar_lea.hbm %s2909_s0, 256 }
  0x16   :  { %s23_s16 = sshll.u32 %s2323_s15, 4  ;;  %p2201_p8 = scmp.ne.s32.totalorder %s2909_s0, %s2200_s19  ;;  %s24_s16 = int_to_ptr.vmem [resolvable:$true] %s23_s16 }
  0x17   :  { %p2204_p9 = scmp.lt.u32.totalorder %s2200_s19, %s2909_s0 }
  0x19   :  { %p2206_p10 = pnand %p2204_p9, %p2201_p8 }
  0x1b   :  { %2209 = shalt.err (!%p2206_p10)
}
  0x1c   :  { %s2210_s24 = scalar_lea.vmem %s24_s16, 256  ;;  %p2215_p12 = scmp.lt.s32.totalorder %s24_s16, %s24_s16 }
  0x1d   :  { %p2211_p11 = scmp.ne.s32.totalorder %s24_s16, %s2210_s24  ;;  %p2216_p13 = scmp.lt.s32.totalorder %s2210_s24, %s2210_s24 }
  0x1f   :  { %p2217_p0 = por %p2216_p13, %p2215_p12 }
  0x21   :  { %p2218_p1 = pnand %p2217_p0, %p2211_p11 }
  0x23   :  { %2221 = shalt.err (!%p2218_p1)
}
  0x24   :  { %s2324_s1 = smov 128   ;;  %s2325_s25 = smov 8  }
  0x25   :  { %29 = dma.hbm_to_vmem [thread:$0]  %s2909_s0, 256, %s24_s16, [#allocation3], %s2324_s1, %s2324_s1, %s2325_s25  }
  0x26   :  { %s2326_s28 = smov [#allocation7]   ;;  %s2327_s30 = smov [#allocation8]  }
  0x27   :  { %s48_s29 = sshll.u32 %s2326_s28, 4  ;;  %s60_s8 = sshll.u32 %s2327_s30, 4  ;;  %s49_s29 = int_to_ptr.vmem [resolvable:$true] %s48_s29  ;;  %s61_s8 = int_to_ptr.vmem [resolvable:$true] %s60_s8 }
  0x28   :  { %s2222_s11 = scalar_lea.hbm %s2911_s2, 128 }
  0x29   :  { %p2223_p2 = scmp.ne.s32.totalorder %s2911_s2, %s2222_s11  ;;  %p2226_p3 = scmp.lt.u32.totalorder %s2222_s11, %s2911_s2 }
  0x2b   :  { %p2228_p4 = pnand %p2226_p3, %p2223_p2 }
  0x2d   :  { %2231 = shalt.err (!%p2228_p4)
}
  0x2e   :  { %s2232_s0 = scalar_lea.vmem %s49_s29, 128  ;;  %p2237_p6 = scmp.lt.s32.totalorder %s49_s29, %s49_s29 }
  0x2f   :  { %p2233_p5 = scmp.ne.s32.totalorder %s49_s29, %s2232_s0  ;;  %p2238_p7 = scmp.lt.s32.totalorder %s2232_s0, %s2232_s0 }
  0x31   :  { %p2239_p8 = por %p2238_p7, %p2237_p6 }
  0x33   :  { %p2240_p9 = pnand %p2239_p8, %p2233_p5 }
  0x35   :  { %2243 = shalt.err (!%p2240_p9)
}
  0x36   :  { %51 = dma.hbm_to_vmem [thread:$0]  %s2911_s2, 128, %s49_s29, [#allocation6]  }
  0x37   :  { %s2244_s20 = scalar_lea.hbm %s2913_s4, 128 }
  0x38   :  { %p2245_p10 = scmp.ne.s32.totalorder %s2913_s4, %s2244_s20  ;;  %p2248_p11 = scmp.lt.u32.totalorder %s2244_s20, %s2913_s4 }
  0x3a   :  { %p2250_p12 = pnand %p2248_p11, %p2245_p10 }
  0x3c   :  { %2253 = shalt.err (!%p2250_p12)
}
  0x3d   :  { %s2254_s1 = scalar_lea.vmem %s61_s8, 128  ;;  %p2259_p0 = scmp.lt.s32.totalorder %s61_s8, %s61_s8 }
  0x3e   :  { %p2255_p13 = scmp.ne.s32.totalorder %s61_s8, %s2254_s1  ;;  %p2260_p1 = scmp.lt.s32.totalorder %s2254_s1, %s2254_s1 }
  0x40   :  { %p2261_p2 = por %p2260_p1, %p2259_p0 }
  0x42   :  { %p2262_p3 = pnand %p2261_p2, %p2255_p13 }
  0x44   :  { %2265 = shalt.err (!%p2262_p3)
}
  0x45   :  { %63 = dma.hbm_to_vmem [thread:$0]  %s2913_s4, 128, %s61_s8, [#allocation9]  }
  0x46   :  { %2310 = dma.done.wait [#allocation3], 256  }
  0x47   :  { %2311 = vsyncadd [#allocation3], 4294967040 }
  0x48   :  { %2312 = dma.done.wait [#allocation6], 16512  }
  0x49   :  { %2313 = vsyncadd [#allocation6], 4294950784 }
  0x4a   :  { %2314 = dma.done.wait [#allocation9], 128  }
  0x4b   :  { %2315 = vsyncadd [#allocation9], 4294967168  ;;  %v2328_v0 = vmov 0.0   ;;  %v83_v1 = vld [vmem:[#allocation5 + $0x18] sm:$0xff]  ;;  %v82_v3 = vld [vmem:[#allocation5 + $0x10] sm:$0xff]  ;;  %vm685_vm0 = vcmask 64512  }
  0x4c   :  { %347 = vmatprep.mubr.f32.mxu1 %v2328_v0  ;;  %272 = vmatprep.mubr.f32.mxu0 %v2328_v0  ;;  %v91_v2 = vld [vmem:[#allocation5 + $0x58] sm:$0xff]  ;;  %v90_v5 = vld [vmem:[#allocation5 + $0x50] sm:$0xff] }
  0x4d   :  { %v1980_v4 = vpack.c.bf16 %v91_v2, %v83_v1  ;;  %v99_v6 = vld [vmem:[#allocation5 + $0x98] sm:$0xff]  ;;  %v1982_v8 = vpack.c.bf16 %v90_v5, %v82_v3  ;;  %v98_v10 = vld [vmem:[#allocation5 + $0x90] sm:$0xff] }
  0x4e   :  { %v107_v7 = vld [vmem:[#allocation5 + $0xd8] sm:$0xff]  ;;  %v106_v11 = vld [vmem:[#allocation5 + $0xd0] sm:$0xff] }
  0x4f   :  { %v1984_v9 = vpack.c.bf16 %v107_v7, %v99_v6  ;;  %v115_v12 = vld [vmem:[#allocation5 + $0x118] sm:$0xff]  ;;  %1981 = vmatprep.subr.bf16.mxu1 %v1980_v4  ;;  %v1986_v14 = vpack.c.bf16 %v106_v11, %v98_v10  ;;  %v114_v16 = vld [vmem:[#allocation5 + $0x110] sm:$0xff] }
  0x50   :  { %v123_v13 = vld [vmem:[#allocation5 + $0x158] sm:$0xff]  ;;  %1983 = vmatpush1.bf16.msra.mxu1 %v1982_v8  ;;  %v122_v17 = vld [vmem:[#allocation5 + $0x150] sm:$0xff] }
  0x51   :  { %1985 = vmatprep.subr.bf16.mxu1 %v1984_v9  ;;  %v1988_v15 = vpack.c.bf16 %v123_v13, %v115_v12  ;;  %v131_v18 = vld [vmem:[#allocation5 + $0x198] sm:$0xff]  ;;  %v1990_v20 = vpack.c.bf16 %v122_v17, %v114_v16  ;;  %v130_v22 = vld [vmem:[#allocation5 + $0x190] sm:$0xff] }
  0x52   :  { %v139_v19 = vld [vmem:[#allocation5 + $0x1d8] sm:$0xff]  ;;  %v138_v23 = vld [vmem:[#allocation5 + $0x1d0] sm:$0xff] }
  0x53   :  { %v1992_v21 = vpack.c.bf16 %v139_v19, %v131_v18  ;;  %v147_v24 = vld [vmem:[#allocation5 + $0x218] sm:$0xff]  ;;  %v1994_v26 = vpack.c.bf16 %v138_v23, %v130_v22  ;;  %v146_v28 = vld [vmem:[#allocation5 + $0x210] sm:$0xff] }
  0x54   :  { %1987 = vmatpush1.bf16.msra.mxu1 %v1986_v14  ;;  %v155_v25 = vld [vmem:[#allocation5 + $0x258] sm:$0xff]  ;;  %v154_v29 = vld [vmem:[#allocation5 + $0x250] sm:$0xff] }
  0x55   :  { %1989 = vmatprep.subr.bf16.mxu1 %v1988_v15  ;;  %v1996_v27 = vpack.c.bf16 %v155_v25, %v147_v24  ;;  %v163_v30 = vld [vmem:[#allocation5 + $0x298] sm:$0xff]  ;;  %v1998_v32 = vpack.c.bf16 %v154_v29, %v146_v28  ;;  %v162_v34 = vld [vmem:[#allocation5 + $0x290] sm:$0xff] }
  0x56   :  { %v171_v31 = vld [vmem:[#allocation5 + $0x2d8] sm:$0xff]  ;;  %v170_v35 = vld [vmem:[#allocation5 + $0x2d0] sm:$0xff] }
  0x57   :  { %v2000_v33 = vpack.c.bf16 %v171_v31, %v163_v30  ;;  %v179_v36 = vld [vmem:[#allocation5 + $0x318] sm:$0xff]  ;;  %v2002_v38 = vpack.c.bf16 %v170_v35, %v162_v34  ;;  %v178_v40 = vld [vmem:[#allocation5 + $0x310] sm:$0xff] }
  0x58   :  { %1991 = vmatpush1.bf16.msra.mxu1 %v1990_v20  ;;  %v187_v37 = vld [vmem:[#allocation5 + $0x358] sm:$0xff]  ;;  %v186_v41 = vld [vmem:[#allocation5 + $0x350] sm:$0xff] }
  0x59   :  { %1993 = vmatprep.subr.bf16.mxu1 %v1992_v21  ;;  %v2004_v39 = vpack.c.bf16 %v187_v37, %v179_v36  ;;  %v195_v42 = vld [vmem:[#allocation5 + $0x398] sm:$0xff]  ;;  %v2006_v44 = vpack.c.bf16 %v186_v41, %v178_v40  ;;  %v194_v46 = vld [vmem:[#allocation5 + $0x390] sm:$0xff] }
  0x5a   :  { %v203_v43 = vld [vmem:[#allocation5 + $0x3d8] sm:$0xff]  ;;  %v202_v47 = vld [vmem:[#allocation5 + $0x3d0] sm:$0xff] }
  0x5b   :  { %v2008_v45 = vpack.c.bf16 %v203_v43, %v195_v42  ;;  %v87_v48 = vld [vmem:[#allocation5 + $0x38] sm:$0xff]  ;;  %v2010_v50 = vpack.c.bf16 %v202_v47, %v194_v46  ;;  %v86_v52 = vld [vmem:[#allocation5 + $0x30] sm:$0xff]  ;;  %v80_v47 = vld [vmem:[#allocation5] sm:$0xff] }
  0x5c   :  { %1995 = vmatpush1.bf16.msra.mxu1 %v1994_v26  ;;  %v95_v49 = vld [vmem:[#allocation5 + $0x78] sm:$0xff]  ;;  %v94_v53 = vld [vmem:[#allocation5 + $0x70] sm:$0xff] }
  0x5d   :  { %1997 = vmatprep.subr.bf16.mxu1 %v1996_v27  ;;  %v2044_v51 = vpack.c.bf16 %v95_v49, %v87_v48  ;;  %v103_v54 = vld [vmem:[#allocation5 + $0xb8] sm:$0xff]  ;;  %v2424_v56 = vld [vmem:[#allocation2] sm:$0xff]  ;;  %v2046_v57 = vpack.c.bf16 %v94_v53, %v86_v52  ;;  %v88_v48 = vld [vmem:[#allocation5 + $0x40] sm:$0xff] }
  0x5e   :  { %v111_v55 = vld [vmem:[#allocation5 + $0xf8] sm:$0xff]  ;;  %v102_v59 = vld [vmem:[#allocation5 + $0xb0] sm:$0xff]  ;;  %v1950_v49 = vpack.c.bf16 %v88_v48, %v80_v47  ;;  %v96_v53 = vld [vmem:[#allocation5 + $0x80] sm:$0xff] }
  0x5f   :  { %v2048_v58 = vpack.c.bf16 %v111_v55, %v103_v54  ;;  %v110_v60 = vld [vmem:[#allocation5 + $0xf0] sm:$0xff]  ;;  %v119_v61 = vld [vmem:[#allocation5 + $0x138] sm:$0xff]  ;;  %v104_v54 = vld [vmem:[#allocation5 + $0xc0] sm:$0xff] }
  0x60   :  { %1999 = vmatpush1.bf16.msra.mxu1 %v1998_v32  ;;  %v127_v62 = vld [vmem:[#allocation5 + $0x178] sm:$0xff]  ;;  %v2050_v63 = vpack.c.bf16 %v110_v60, %v102_v59  ;;  %v118_v3 = vld [vmem:[#allocation5 + $0x130] sm:$0xff]  ;;  %v1954_v55 = vpack.c.bf16 %v104_v54, %v96_v53  ;;  %v112_v60 = vld [vmem:[#allocation5 + $0x100] sm:$0xff] }
  0x61   :  { %2001 = vmatprep.subr.bf16.mxu1 %v2000_v33  ;;  %v2428_v1 = vld [vmem:[#allocation2 + $0x8] sm:$0xff]  ;;  %v2052_v2 = vpack.c.bf16 %v127_v62, %v119_v61  ;;  %v126_v4 = vld [vmem:[#allocation5 + $0x170] sm:$0xff]  ;;  %v120_v61 = vld [vmem:[#allocation5 + $0x140] sm:$0xff] }
  0x62   :  { %v135_v5 = vld [vmem:[#allocation5 + $0x1b8] sm:$0xff]  ;;  %v2054_v7 = vpack.c.bf16 %v126_v4, %v118_v3  ;;  %v134_v9 = vld [vmem:[#allocation5 + $0x1b0] sm:$0xff]  ;;  %v1958_v62 = vpack.c.bf16 %v120_v61, %v112_v60  ;;  %v128_v3 = vld [vmem:[#allocation5 + $0x180] sm:$0xff] }
  0x63   :  { %v143_v6 = vld [vmem:[#allocation5 + $0x1f8] sm:$0xff]  ;;  %v142_v10 = vld [vmem:[#allocation5 + $0x1f0] sm:$0xff]  ;;  %v116_v48 = vld [vmem:[#allocation5 + $0x120] sm:$0xff] }
  0x64   :  { %2003 = vmatpush1.bf16.msra.mxu1 %v2002_v38  ;;  %v2056_v8 = vpack.c.bf16 %v143_v6, %v135_v5  ;;  %v151_v11 = vld [vmem:[#allocation5 + $0x238] sm:$0xff]  ;;  %v2058_v13 = vpack.c.bf16 %v142_v10, %v134_v9  ;;  %v150_v15 = vld [vmem:[#allocation5 + $0x230] sm:$0xff]  ;;  %v136_v5 = vld [vmem:[#allocation5 + $0x1c0] sm:$0xff] }
  0x65   :  { %2005 = vmatprep.subr.bf16.mxu1 %v2004_v39  ;;  %v159_v12 = vld [vmem:[#allocation5 + $0x278] sm:$0xff]  ;;  %v158_v16 = vld [vmem:[#allocation5 + $0x270] sm:$0xff]  ;;  %v145_v6 = vld [vmem:[#allocation5 + $0x208] sm:$0xff] }
  0x66   :  { %v2060_v14 = vpack.c.bf16 %v159_v12, %v151_v11  ;;  %v167_v17 = vld [vmem:[#allocation5 + $0x2b8] sm:$0xff]  ;;  %v2062_v19 = vpack.c.bf16 %v158_v16, %v150_v15  ;;  %v166_v21 = vld [vmem:[#allocation5 + $0x2b0] sm:$0xff]  ;;  %v144_v10 = vld [vmem:[#allocation5 + $0x200] sm:$0xff] }
  0x67   :  { %v175_v18 = vld [vmem:[#allocation5 + $0x2f8] sm:$0xff]  ;;  %v174_v22 = vld [vmem:[#allocation5 + $0x2f0] sm:$0xff]  ;;  %v152_v11 = vld [vmem:[#allocation5 + $0x240] sm:$0xff] }
  0x68   :  { %2007 = vmatpush1.bf16.msra.mxu1 %v2006_v44  ;;  %v2064_v20 = vpack.c.bf16 %v175_v18, %v167_v17  ;;  %v183_v23 = vld [vmem:[#allocation5 + $0x338] sm:$0xff]  ;;  %v2066_v25 = vpack.c.bf16 %v174_v22, %v166_v21  ;;  %v182_v27 = vld [vmem:[#allocation5 + $0x330] sm:$0xff]  ;;  %v81_v44 = vld [vmem:[#allocation5 + $0x8] sm:$0xff] }
  0x69   :  { %2009 = vmatprep.subr.bf16.mxu1 %v2008_v45  ;;  %v191_v24 = vld [vmem:[#allocation5 + $0x378] sm:$0xff]  ;;  %v190_v28 = vld [vmem:[#allocation5 + $0x370] sm:$0xff]  ;;  %v89_v45 = vld [vmem:[#allocation5 + $0x48] sm:$0xff] }
  0x6a   :  { %v2068_v26 = vpack.c.bf16 %v191_v24, %v183_v23  ;;  %v199_v29 = vld [vmem:[#allocation5 + $0x3b8] sm:$0xff]  ;;  %v2070_v31 = vpack.c.bf16 %v190_v28, %v182_v27  ;;  %v198_v33 = vld [vmem:[#allocation5 + $0x3b0] sm:$0xff]  ;;  %v1948_v46 = vpack.c.bf16 %v89_v45, %v81_v44  ;;  %v161_v12 = vld [vmem:[#allocation5 + $0x288] sm:$0xff] }
  0x6b   :  { %v207_v30 = vld [vmem:[#allocation5 + $0x3f8] sm:$0xff]  ;;  %v206_v34 = vld [vmem:[#allocation5 + $0x3f0] sm:$0xff]  ;;  %v160_v16 = vld [vmem:[#allocation5 + $0x280] sm:$0xff] }
  0x6c   :  { %2011 = vmatpush1.bf16.msra.mxu1 %v2010_v50  ;;  %v2072_v32 = vpack.c.bf16 %v207_v30, %v199_v29  ;;  %v2074_v35 = vpack.c.bf16 %v206_v34, %v198_v33  ;;  %1949 = vmatprep.subr.bf16.mxu0 %v1948_v46  ;;  %v97_v50 = vld [vmem:[#allocation5 + $0x88] sm:$0xff]  ;;  %v168_v17 = vld [vmem:[#allocation5 + $0x2c0] sm:$0xff] }
  0x6d   :  { %2045 = vmatprep.subr.bf16.mxu1 %v2044_v51  ;;  %v105_v51 = vld [vmem:[#allocation5 + $0xc8] sm:$0xff]  ;;  %1951 = vmatpush1.bf16.msra.mxu0 %v1950_v49  ;;  %v176_v22 = vld [vmem:[#allocation5 + $0x300] sm:$0xff] }
  0x6e   :  { %v1952_v52 = vpack.c.bf16 %v105_v51, %v97_v50  ;;  %v177_v18 = vld [vmem:[#allocation5 + $0x308] sm:$0xff]  ;;  %v184_v23 = vld [vmem:[#allocation5 + $0x340] sm:$0xff] }
  0x6f   :  { %348 = vmatmul.mubr.f32.vlgmr.msra.gmra.mrb[0].mxu1 %v2424_v56  ;;  %v193_v24 = vld [vmem:[#allocation5 + $0x388] sm:$0xff]  ;;  %v192_v28 = vld [vmem:[#allocation5 + $0x380] sm:$0xff] }
  0x70   :  { %2047 = vmatpush1.bf16.msra.mxu1 %v2046_v57  ;;  %353 = vmatprep.mubr.f32.mxu1 %v2328_v0  ;;  %v113_v57 = vld [vmem:[#allocation5 + $0x108] sm:$0xff]  ;;  %v200_v29 = vld [vmem:[#allocation5 + $0x3c0] sm:$0xff] }
  0x71   :  { %2049 = vmatprep.subr.bf16.mxu1 %v2048_v58  ;;  %1953 = vmatprep.subr.bf16.mxu0 %v1952_v52  ;;  %v121_v58 = vld [vmem:[#allocation5 + $0x148] sm:$0xff]  ;;  %v84_v34 = vld [vmem:[#allocation5 + $0x20] sm:$0xff] }
  0x72   :  { %v1956_v59 = vpack.c.bf16 %v121_v58, %v113_v57  ;;  %1955 = vmatpush1.bf16.msra.mxu0 %v1954_v55  ;;  %v85_v30 = vld [vmem:[#allocation5 + $0x28] sm:$0xff]  ;;  %v124_v49 = vld [vmem:[#allocation5 + $0x160] sm:$0xff] }
  0x73   :  { %354 = vmatmul.mubr.f32.gmra.mrb[2].mxu1 %v2428_v1  ;;  %v117_v44 = vld [vmem:[#allocation5 + $0x128] sm:$0xff]  ;;  %v2022_v52 = vpack.c.bf16 %v124_v49, %v116_v48  ;;  %v132_v54 = vld [vmem:[#allocation5 + $0x1a0] sm:$0xff]  ;;  %v2329_v49 = vmov 1966171168  }
  0x74   :  { %2051 = vmatpush1.bf16.msra.mxu1 %v2050_v63  ;;  %497 = vmatprep.mubr.f32.mxu1 %v2328_v0  ;;  %v129_v63 = vld [vmem:[#allocation5 + $0x188] sm:$0xff]  ;;  %v140_v55 = vld [vmem:[#allocation5 + $0x1e0] sm:$0xff] }
  0x75   :  { %2053 = vmatprep.subr.bf16.mxu1 %v2052_v2  ;;  %1957 = vmatprep.subr.bf16.mxu0 %v1956_v59  ;;  %v137_v2 = vld [vmem:[#allocation5 + $0x1c8] sm:$0xff]  ;;  %v2026_v59 = vpack.c.bf16 %v140_v55, %v132_v54  ;;  %v148_v61 = vld [vmem:[#allocation5 + $0x220] sm:$0xff] }
  0x76   :  { %v1960_v4 = vpack.c.bf16 %v137_v2, %v129_v63  ;;  %1959 = vmatpush1.bf16.msra.mxu0 %v1958_v62  ;;  %v125_v45 = vld [vmem:[#allocation5 + $0x168] sm:$0xff]  ;;  %v156_v62 = vld [vmem:[#allocation5 + $0x260] sm:$0xff] }
  0x77   :  { %v2020_v47 = vpack.c.bf16 %v125_v45, %v117_v44  ;;  %v133_v50 = vld [vmem:[#allocation5 + $0x1a8] sm:$0xff] }
  0x78   :  { %2055 = vmatpush1.bf16.msra.mxu1 %v2054_v7  ;;  %v153_v7 = vld [vmem:[#allocation5 + $0x248] sm:$0xff]  ;;  %1961 = vmatprep.subr.bf16.mxu0 %v1960_v4 }
  0x79   :  { %2057 = vmatprep.subr.bf16.mxu1 %v2056_v8  ;;  %v1962_v8 = vpack.c.bf16 %v136_v5, %v128_v3  ;;  %v1964_v9 = vpack.c.bf16 %v153_v7, %v145_v6  ;;  %v141_v51 = vld [vmem:[#allocation5 + $0x1e8] sm:$0xff]  ;;  %v2030_v3 = vpack.c.bf16 %v156_v62, %v148_v61  ;;  %v164_v5 = vld [vmem:[#allocation5 + $0x2a0] sm:$0xff]  ;;  %v2472_v61 = vld [vmem:[%s2912_s3] sm:$0xff] }
  0x7a   :  { %v2024_v53 = vpack.c.bf16 %v141_v51, %v133_v50  ;;  %v149_v57 = vld [vmem:[#allocation5 + $0x228] sm:$0xff]  ;;  %v172_v6 = vld [vmem:[#allocation5 + $0x2e0] sm:$0xff]  ;;  %v620_v50 = vunpack.c.l.s4 %v2329_v49 }
  0x7b   :  { %1963 = vmatpush1.bf16.msra.mxu0 %v1962_v8  ;;  %v157_v58 = vld [vmem:[#allocation5 + $0x268] sm:$0xff] }
  0x7c   :  { %2059 = vmatpush1.bf16.msra.mxu1 %v2058_v13  ;;  %v169_v13 = vld [vmem:[#allocation5 + $0x2c8] sm:$0xff]  ;;  %1965 = vmatprep.subr.bf16.mxu0 %v1964_v9  ;;  %v2028_v60 = vpack.c.bf16 %v157_v58, %v149_v57  ;;  %v2034_v9 = vpack.c.bf16 %v172_v6, %v164_v5  ;;  %v621_v51 = vunpack.c.0.s8 %v620_v50  ;;  %v1880_v6 = vadd.f32 -1.0, %v2472_v61 }
  0x7d   :  { %2061 = vmatprep.subr.bf16.mxu1 %v2060_v14  ;;  %v1966_v14 = vpack.c.bf16 %v152_v11, %v144_v10  ;;  %v1968_v15 = vpack.c.bf16 %v169_v13, %v161_v12  ;;  %v165_v63 = vld [vmem:[#allocation5 + $0x2a8] sm:$0xff]  ;;  %v180_v11 = vld [vmem:[#allocation5 + $0x320] sm:$0xff] }
  0x7e   :  { %v173_v2 = vld [vmem:[#allocation5 + $0x2e8] sm:$0xff]  ;;  %v188_v12 = vld [vmem:[#allocation5 + $0x360] sm:$0xff] }
  0x7f   :  { %1967 = vmatpush1.bf16.msra.mxu0 %v1966_v14  ;;  %v2032_v4 = vpack.c.bf16 %v173_v2, %v165_v63  ;;  %v181_v7 = vld [vmem:[#allocation5 + $0x328] sm:$0xff] }
  0x80   :  { %2063 = vmatpush1.bf16.msra.mxu1 %v2062_v19  ;;  %v185_v19 = vld [vmem:[#allocation5 + $0x348] sm:$0xff]  ;;  %1969 = vmatprep.subr.bf16.mxu0 %v1968_v15  ;;  %v2038_v15 = vpack.c.bf16 %v188_v12, %v180_v11  ;;  %v2494_v11 = vld [vmem:[%s2914_s5] sm:$0xff]  ;;  %s2332_s5 = smov [#allocation10]  }
  0x81   :  { %2065 = vmatprep.subr.bf16.mxu1 %v2064_v20  ;;  %v1970_v20 = vpack.c.bf16 %v168_v17, %v160_v16  ;;  %v1972_v21 = vpack.c.bf16 %v185_v19, %v177_v18  ;;  %v189_v8 = vld [vmem:[#allocation5 + $0x368] sm:$0xff]  ;;  %v196_v17 = vld [vmem:[#allocation5 + $0x3a0] sm:$0xff]  ;;  %s1851_s28 = sshll.u32 %s2332_s5, 4  ;;  %s1852_s28 = int_to_ptr.vmem [resolvable:$true] %s1851_s28 }
  0x82   :  { %v2036_v10 = vpack.c.bf16 %v189_v8, %v181_v7  ;;  %v197_v13 = vld [vmem:[#allocation5 + $0x3a8] sm:$0xff]  ;;  %v204_v18 = vld [vmem:[#allocation5 + $0x3e0] sm:$0xff]  ;;  %s2266_s29 = scalar_lea.vmem %s1852_s28, 128  ;;  %p2271_p5 = scmp.lt.s32.totalorder %s1852_s28, %s1852_s28 }
  0x83   :  { %1971 = vmatpush1.bf16.msra.mxu0 %v1970_v20  ;;  %v205_v14 = vld [vmem:[#allocation5 + $0x3e8] sm:$0xff]  ;;  %v2042_v19 = vpack.c.bf16 %v204_v18, %v196_v17  ;;  %v572_v20 = vlaneseq  ;;  %p2267_p4 = scmp.ne.s32.totalorder %s1852_s28, %s2266_s29  ;;  %p2272_p6 = scmp.lt.s32.totalorder %s2266_s29, %s2266_s29 }
  0x84   :  { %2067 = vmatpush1.bf16.msra.mxu1 %v2066_v25  ;;  %v201_v25 = vld [vmem:[#allocation5 + $0x3c8] sm:$0xff]  ;;  %1973 = vmatprep.subr.bf16.mxu0 %v1972_v21  ;;  %v2040_v16 = vpack.c.bf16 %v205_v14, %v197_v13 }
  0x85   :  { %2069 = vmatprep.subr.bf16.mxu1 %v2068_v26  ;;  %v1974_v26 = vpack.c.bf16 %v184_v23, %v176_v22  ;;  %v1976_v27 = vpack.c.bf16 %v201_v25, %v193_v24  ;;  %v2446_v21 = vshrl.u32 %v572_v20, 7  ;;  %v2484_v7 = vand.u32 127, %v572_v20  ;;  %p2273_p7 = por %p2272_p6, %p2271_p5 }
  0x87   :  { %1975 = vmatpush1.bf16.msra.mxu0 %v1974_v26  ;;  %v606_v22 = vsub.s32 2, %v2446_v21  ;;  %v2451_v23 = vsub.s32 0, %v2446_v21  ;;  %v599_v24 = vsub.s32 1, %v2446_v21  ;;  %v2487_v8 = vadd.s32 1, %v2446_v21  ;;  %p2274_p8 = pnand %p2273_p7, %p2267_p4 }
  0x88   :  { %2071 = vmatpush1.bf16.msra.mxu1 %v2070_v31  ;;  %v93_v31 = vld [vmem:[#allocation5 + $0x68] sm:$0xff]  ;;  %1977 = vmatprep.subr.bf16.mxu0 %v1976_v27 }
  0x89   :  { %2073 = vmatprep.subr.bf16.mxu1 %v2072_v32  ;;  %v1978_v32 = vpack.c.bf16 %v200_v29, %v192_v28  ;;  %v2012_v33 = vpack.c.bf16 %v93_v31, %v85_v30  ;;  %v613_v28 = vsub.s32 3, %v2446_v21  ;;  %v1224_v31 = vsub.s32 5, %v2446_v21 }
  0x8a   :  { %v579_v49 = vmul.u32 8, %v2487_v8 }
  0x8b   :  { %1979 = vmatpush1.bf16.msra.mxu0 %v1978_v32 }
  0x8c   :  { %2075 = vmatpush1.bf16.msra.mxu1 %v2074_v35  ;;  %v92_v35 = vld [vmem:[#allocation5 + $0x60] sm:$0xff]  ;;  %2013 = vmatprep.subr.bf16.mxu0 %v2012_v33  ;;  %v1231_v33 = vsub.s32 6, %v2446_v21  ;;  %vm2550_vm5 = vcmp.lt.s32.totalorder %v2484_v7, %v579_v49 }
  0x8e   :  { %273 = vmatmul.mubr.f32.vlgmr.msra.gmra.mrb[0].mxu0 %v2424_v56 }
  0x8f   :  { %498 = vmatmul.mubr.f32.vlgmr.msra.gmra.mrb[4].mxu1 %v2424_v56  ;;  %278 = vmatprep.mubr.f32.mxu0 %v2328_v0 }
  0x90   :  { %501 = vmatprep.mubr.f32.mxu1 %v2328_v0 }
  0x92   :  { %279 = vmatmul.mubr.f32.gmra.mrb[2].mxu0 %v2428_v1 }
  0x93   :  { %502 = vmatmul.mubr.f32.gmra.mrb[6].mxu1 %v2428_v1  ;;  %422 = vmatprep.mubr.f32.mxu0 %v2328_v0 }
 0x142   :  { %v2435_v36 = vpop.f32.mrb[0].mxu1 }
 0x143   :  { %v351_v37 = vpop.f32.mrb[1].mxu1 }
 0x144   :  { %508 = vxpose.xlu0.b32.start.end [1/1] (short) (narrow) %v351_v37, 16  ;;  %v101_v37 = vld [vmem:[#allocation5 + $0xa8] sm:$0xff] }
 0x146   :  { %v355_v38 = vpop.f32.mrb[2].mxu1 }
 0x147   :  { %v356_v39 = vpop.f32.mrb[3].mxu1  ;;  %v109_v38 = vld [vmem:[#allocation5 + $0xe8] sm:$0xff] }
 0x148   :  { %v2014_v39 = vpack.c.bf16 %v92_v35, %v84_v34  ;;  %v1238_v35 = vsub.s32 7, %v2446_v21 }
 0x14a   :  { %2015 = vmatpush1.bf16.msra.mxu0 %v2014_v39 }
 0x162   :  { %v499_v40 = vpop.f32.mrb[4].mxu1 }
 0x163   :  { %v500_v41 = vpop.f32.mrb[5].mxu1  ;;  %v2016_v40 = vpack.c.bf16 %v109_v38, %v101_v37 }
 0x164   :  { %v100_v41 = vld [vmem:[#allocation5 + $0xa0] sm:$0xff] }
 0x165   :  { %2017 = vmatprep.subr.bf16.mxu0 %v2016_v40 }
 0x166   :  { %v2437_v42 = vpop.f32.mrb[6].mxu1 }
 0x167   :  { %v505_v43 = vpop.f32.mrb[7].mxu1 }
 0x168   :  { %540 = vxpose.xlu0.b32.start.end [1/1] (short) (narrow) %v505_v43, 16  ;;  %v108_v43 = vld [vmem:[#allocation5 + $0xe0] sm:$0xff] }
 0x169   :  { %v2018_v46 = vpack.c.bf16 %v108_v43, %v100_v41 }
 0x16b   :  { %2019 = vmatpush1.bf16.msra.mxu0 %v2018_v46 }
 0x16c   :  { %2021 = vmatprep.subr.bf16.mxu0 %v2020_v47 }
 0x16f   :  { %2023 = vmatpush1.bf16.msra.mxu0 %v2022_v52 }
 0x170   :  { %2025 = vmatprep.subr.bf16.mxu0 %v2024_v53  ;;  %v2462_v53 = vsub.s32 %v621_v51, %v2446_v21 }
 0x173   :  { %2027 = vmatpush1.bf16.msra.mxu0 %v2026_v59 }
 0x174   :  { %2029 = vmatprep.subr.bf16.mxu0 %v2028_v60  ;;  %v2467_v60 = vld [vmem:[#allocation7] sm:$0xff] }
 0x177   :  { %2031 = vmatpush1.bf16.msra.mxu0 %v2030_v3 }
 0x178   :  { %2033 = vmatprep.subr.bf16.mxu0 %v2032_v4  ;;  %v1876_v4 = vadd.f32 -1.0, %v2467_v60 }
 0x17b   :  { %2035 = vmatpush1.bf16.msra.mxu0 %v2034_v9 }
 0x17c   :  { %2037 = vmatprep.subr.bf16.mxu0 %v2036_v10  ;;  %v2489_v10 = vld [vmem:[#allocation8] sm:$0xff] }
 0x17f   :  { %2039 = vmatpush1.bf16.msra.mxu0 %v2038_v15 }
 0x180   :  { %2041 = vmatprep.subr.bf16.mxu0 %v2040_v16  ;;  %v2501_v16 = vmul.f32 1e+30, %v1876_v4 }
 0x183   :  { %2043 = vmatpush1.bf16.msra.mxu0 %v2042_v19  ;;  %v2505_v19 = vmul.f32 1e+30, %v1880_v6 }
 0x186   :  { %423 = vmatmul.mubr.f32.vlgmr.msra.gmra.mrb[4].mxu0 %v2424_v56 }
 0x187   :  { %426 = vmatprep.mubr.f32.mxu0 %v2328_v0 }
 0x18a   :  { %427 = vmatmul.mubr.f32.gmra.mrb[6].mxu0 %v2428_v1  ;;  %v1217_v1 = vsub.s32 4, %v2446_v21 }
 0x1c4   :  { %v524_v25 = vpop.trf.xlu0 }
 0x1c5   :  { %v593_v26 = vrot.slane %v524_v25, %v2451_v23  ;;  %v607_v27 = vrot.slane %v524_v25, %v606_v22  ;;  %v600_v56 = vrot.slane %v524_v25, %v599_v24  ;;  %v614_v29 = vrot.slane %v524_v25, %v613_v28 }
 0x1c6   :  { %v1218_v30 = vrot.slane %v524_v25, %v1217_v1  ;;  %v1225_v32 = vrot.slane %v524_v25, %v1224_v31  ;;  %v1232_v34 = vrot.slane %v524_v25, %v1231_v33  ;;  %v1239_v37 = vrot.slane %v524_v25, %v1238_v35 }
 0x1c7   :  { %595 = vbcast.lane.b32.xlu1 %v593_v26, 256  ;;  %609 = vbcast.lane.b32.xlu0 %v607_v27, 256  ;;  %v1878_v26 = vadd.f32 -1.0, %v2489_v10  ;;  %v1882_v27 = vadd.f32 -1.0, %v2494_v11 }
 0x1c8   :  { %v525_v38 = vpop.trf.xlu0 }
 0x1c9   :  { %v954_v52 = vcombine.high %v525_v38, %v525_v38  ;;  %v625_v54 = vrot.slane %v525_v38, %v2462_v53 }
 0x1cb   :  { %602 = vbcast.lane.b32.xlu1 %v600_v56, 256  ;;  %v961_v55 = vrot.slane %v954_v52, %v2462_v53  ;;  %v626_v57 = vcombine.high %v625_v54, %v625_v54  ;;  %v633_v59 = vrot.slane %v625_v54, %v2462_v53  ;;  %v2330_v54 = vmov 0.0|0.0  }
 0x1cc   :  { %2076 = vmatprep.subr.bf16.mxu0 %v2330_v54  ;;  %2082 = vmatprep.subr.bf16.mxu1 %v2330_v54 }
 0x1cd   :  { %v962_v58 = vcombine.high %v961_v55, %v961_v55  ;;  %v640_v62 = vrot.slane %v626_v57, %v2462_v53  ;;  %v2476_v2 = vrot.slane %v961_v55, %v2462_v53  ;;  %v641_v5 = vcombine.high %v633_v59, %v633_v59 }
 0x1ce   :  { %v646_v17 = vrot.slane %v633_v59, %v2451_v23 }
 0x1cf   :  { %616 = vbcast.lane.b32.xlu1 %v614_v29, 256  ;;  %v2479_v3 = vrot.slane %v962_v58, %v2462_v53  ;;  %v642_v9 = vcombine.high %v640_v62, %v640_v62  ;;  %v977_v14 = vcombine.high %v2476_v2, %v2476_v2  ;;  %v654_v18 = vrot.slane %v641_v5, %v2451_v23 }
 0x1d0   :  { %v650_v25 = vrot.slane %v640_v62, %v2451_v23 }
 0x1d1   :  { %v978_v15 = vcombine.high %v2479_v3, %v2479_v3  ;;  %v658_v29 = vrot.slane %v642_v9, %v2451_v23 }
 0x1d3   :  { %1220 = vbcast.lane.b32.xlu1 %v1218_v30, 256 }
 0x1d7   :  { %1227 = vbcast.lane.b32.xlu1 %v1225_v32, 256  ;;  %v2517_v32 = vrot.slane %v977_v14, %v2451_v23 }
 0x1db   :  { %1234 = vbcast.lane.b32.xlu1 %v1232_v34, 256 }
 0x1df   :  { %1241 = vbcast.lane.b32.xlu1 %v1239_v37, 256 }
 0x1e8   :  { %v556_v39 = vpop.trf.xlu0 }
 0x1e9   :  { %v1573_v40 = vrot.slane %v556_v39, %v1238_v35  ;;  %v929_v41 = vrot.slane %v556_v39, %v2451_v23  ;;  %v936_v43 = vrot.slane %v556_v39, %v599_v24  ;;  %v943_v44 = vrot.slane %v556_v39, %v606_v22 }
 0x1ea   :  { %v950_v45 = vrot.slane %v556_v39, %v613_v28  ;;  %v1552_v46 = vrot.slane %v556_v39, %v1217_v1  ;;  %v1559_v47 = vrot.slane %v556_v39, %v1224_v31  ;;  %v1566_v48 = vrot.slane %v556_v39, %v1231_v33 }
 0x1eb   :  { %1575 = vbcast.lane.b32.xlu0 %v1573_v40, 256  ;;  %931 = vbcast.lane.b32.xlu1 %v929_v41, 256  ;;  %v982_v1 = vrot.slane %v2476_v2, %v2451_v23  ;;  %v986_v31 = vrot.slane %v2479_v3, %v2451_v23  ;;  %v2520_v33 = vrot.slane %v978_v15, %v2451_v23  ;;  %v2526_v40 = vmul.f32 1e+30, %v1878_v26 }
 0x1ec   :  { %v557_v63 = vpop.trf.xlu0  ;;  %v2528_v41 = vmul.f32 1e+30, %v1882_v27 }
 0x1ed   :  { %v1250_v12 = vrot.slane %v557_v63, %v2462_v53  ;;  %v1577_v13 = vcombine.high %v557_v63, %v557_v63 }
 0x1ef   :  { %938 = vbcast.lane.b32.xlu1 %v936_v43, 256  ;;  %v1251_v20 = vcombine.high %v1250_v12, %v1250_v12  ;;  %v1584_v30 = vrot.slane %v1577_v13, %v2462_v53  ;;  %v1258_v37 = vrot.slane %v1250_v12, %v2462_v53 }
 0x1f1   :  { %v2524_v39 = vrot.slane %v1251_v20, %v2462_v53  ;;  %v1585_v50 = vcombine.high %v1584_v30, %v1584_v30  ;;  %v1266_v52 = vcombine.high %v1258_v37, %v1258_v37  ;;  %v1271_v12 = vrot.slane %v1258_v37, %v2451_v23 }
 0x1f2   :  { %v2561_v14 = vrot.slane %v1584_v30, %v2462_v53 }
 0x1f3   :  { %945 = vbcast.lane.b32.xlu1 %v943_v44, 256  ;;  %v1275_v13 = vrot.slane %v2524_v39, %v2451_v23  ;;  %v2569_v26 = vrot.slane %v1585_v50, %v2462_v53 }
 0x1f4   :  { %v1600_v37 = vcombine.high %v2561_v14, %v2561_v14 }
 0x1f5   :  { %v1601_v59 = vcombine.high %v2569_v26, %v2569_v26 }
 0x1f7   :  { %952 = vbcast.lane.b32.xlu1 %v950_v45, 256 }
 0x1fb   :  { %1554 = vbcast.lane.b32.xlu1 %v1552_v46, 256  ;;  %v576_v46 = vmul.u32 8, %v2446_v21 }
 0x1fd   :  { %vm2545_vm4 = vcmp.ge.s32.totalorder %v2484_v7, %v576_v46 }
 0x1fe   :  { %vm581_vm7 = vmand %vm2545_vm4, %vm2550_vm5 }
 0x1ff   :  { %1561 = vbcast.lane.b32.xlu1 %v1559_v47, 256 }
 0x203   :  { %1568 = vbcast.lane.b32.xlu1 %v1566_v48, 256 }
 0x239   :  { %v596_v22 = vpop.permute.xlu1 %595  ;;  %v610_v24 = vpop.permute.xlu0 %609 }
 0x23a   :  { %v663_v56 = vadd.f32 %v646_v17, %v596_v22  ;;  %v665_v28 = vadd.f32 %v654_v18, %v610_v24  ;;  %v1279_v24 = vrot.slane %v1266_v52, %v2451_v23 }
 0x23c   :  { %vm667_vm1 = vcmp.ge.f32.partialorder %v663_v56, 0.0  ;;  %v671_v34 = vmul.f32 0.2, %v663_v56  ;;  %vm669_vm2 = vcmp.ge.f32.partialorder %v665_v28, 0.0  ;;  %v673_v35 = vmul.f32 0.2, %v665_v28 }
 0x23d   :  { %v603_v38 = vpop.permute.xlu1 %602 }
 0x23e   :  { %v675_v43 = vsel %vm667_vm1, %v663_v56, %v671_v34  ;;  %v677_v44 = vsel %vm669_vm2, %v665_v28, %v673_v35  ;;  %v664_v45 = vadd.f32 %v650_v25, %v603_v38  ;;  %v1267_v25 = vcombine.high %v2524_v39, %v2524_v39 }
 0x23f   :  { %v2532_v47 = vadd.f32 %v2501_v16, %v675_v43  ;;  %v2535_v48 = vadd.f32 %v2501_v16, %v677_v44  ;;  %v1605_v35 = vrot.slane %v2561_v14, %v2451_v23  ;;  %v582_v44 = vsel %vm581_vm7, 1.0, %v2328_v0 }
 0x240   :  { %vm668_vm3 = vcmp.ge.f32.partialorder %v664_v45, 0.0  ;;  %v672_v51 = vmul.f32 0.2, %v664_v45  ;;  %v777_v62 = vrot.slane %v582_v44, %v2462_v53 }
 0x241   :  { %v686_v55 = vsel %vm685_vm0, %v2532_v47, -inf  ;;  %v700_v57 = vsel %vm685_vm0, %v2535_v48, -inf  ;;  %v617_v58 = vpop.permute.xlu1 %616 }
 0x242   :  { %v687_v63 = vrot.slane %v686_v55, 4  ;;  %v701_v4 = vrot.slane %v700_v57, 4  ;;  %v676_v5 = vsel %vm668_vm3, %v664_v45, %v672_v51  ;;  %v666_v6 = vadd.f32 %v658_v29, %v617_v58 }
 0x243   :  { %v2555_v9 = vadd.f32 %v2501_v16, %v676_v5 }
 0x244   :  { %v688_v15 = vmax.f32 %v686_v55, %v687_v63  ;;  %v702_v17 = vmax.f32 %v700_v57, %v701_v4  ;;  %vm670_vm6 = vcmp.ge.f32.partialorder %v666_v6, 0.0  ;;  %v674_v18 = vmul.f32 0.2, %v666_v6 }
 0x245   :  { %v693_v20 = vsel %vm685_vm0, %v2555_v9, -inf  ;;  %v1221_v22 = vpop.permute.xlu1 %1220 }
 0x246   :  { %v689_v27 = vrot.slane %v688_v15, 2  ;;  %v703_v56 = vrot.slane %v702_v17, 2  ;;  %v694_v28 = vrot.slane %v693_v20, 4  ;;  %v678_v29 = vsel %vm670_vm6, %v666_v6, %v674_v18 }
 0x247   :  { %v2576_v30 = vadd.f32 %v2501_v16, %v678_v29  ;;  %v1288_v34 = vadd.f32 %v1271_v12, %v1221_v22  ;;  %v1283_v16 = vrot.slane %v1267_v25, %v2451_v23  ;;  %v1609_v18 = vrot.slane %v2569_v26, %v2451_v23 }
 0x248   :  { %v690_v38 = vmax.f32 %v688_v15, %v689_v27  ;;  %v704_v39 = vmax.f32 %v702_v17, %v703_v56  ;;  %v695_v43 = vmax.f32 %v693_v20, %v694_v28  ;;  %v778_v29 = vcombine.high %v777_v62, %v777_v62 }
 0x249   :  { %v707_v45 = vsel %vm685_vm0, %v2576_v30, -inf  ;;  %vm1292_vm8 = vcmp.ge.f32.partialorder %v1288_v34, 0.0  ;;  %v1296_v46 = vmul.f32 0.2, %v1288_v34  ;;  %v1228_v49 = vpop.permute.xlu1 %1227 }
 0x24a   :  { %v691_v50 = vrot.slane %v690_v38, 1  ;;  %v705_v51 = vrot.slane %v704_v39, 1  ;;  %v696_v52 = vrot.slane %v695_v43, 2  ;;  %v708_v55 = vrot.slane %v707_v45, 4 }
 0x24b   :  { %v1300_v57 = vsel %vm1292_vm8, %v1288_v34, %v1296_v46  ;;  %v1289_v58 = vadd.f32 %v1275_v13, %v1228_v49  ;;  %vm851_vm8 = vcmask 261120  }
 0x24c   :  { %v692_v63 = vmax.f32 %v690_v38, %v691_v50  ;;  %v706_v4 = vmax.f32 %v704_v39, %v705_v51  ;;  %v697_v5 = vmax.f32 %v695_v43, %v696_v52  ;;  %v709_v6 = vmax.f32 %v707_v45, %v708_v55 }
 0x24d   :  { %v2590_v12 = vadd.f32 %v2505_v19, %v1300_v57  ;;  %vm1293_vm9 = vcmp.ge.f32.partialorder %v1289_v58, 0.0  ;;  %v1297_v15 = vmul.f32 0.2, %v1289_v58  ;;  %v1235_v17 = vpop.permute.xlu1 %1234 }
 0x24e   :  { %v714_v13 = vsub.f32 %v2532_v47, %v692_v63  ;;  %v716_v20 = vsub.f32 %v2535_v48, %v706_v4  ;;  %v698_v22 = vrot.slane %v697_v5, 1  ;;  %v710_v25 = vrot.slane %v709_v6, 2 }
 0x24f   :  { %v1310_v27 = vsel %vm685_vm0, %v2590_v12, -inf  ;;  %v1301_v56 = vsel %vm1293_vm9, %v1289_v58, %v1297_v15  ;;  %v1290_v28 = vadd.f32 %v1279_v24, %v1235_v17  ;;  %v785_v63 = vrot.slane %v777_v62, %v2462_v53 }
 0x250   :  { %v718_v34 = vmul.f32 1.442695, %v714_v13  ;;  %v722_v38 = vmul.f32 1.442695, %v716_v20  ;;  %v699_v39 = vmax.f32 %v697_v5, %v698_v22  ;;  %v711_v43 = vmax.f32 %v709_v6, %v710_v25 }
 0x251   :  { %v1311_v44 = vrot.slane %v1310_v27, 4  ;;  %v2599_v45 = vadd.f32 %v2505_v19, %v1301_v56  ;;  %vm1294_vm10 = vcmp.ge.f32.partialorder %v1290_v28, 0.0  ;;  %v1298_v47 = vmul.f32 0.2, %v1290_v28  ;;  %v1242_v46 = vpop.permute.xlu1 %1241 }
 0x252   :  { %2114 = vpow2.f32 %v718_v34  ;;  %v715_v48 = vsub.f32 %v2555_v9, %v699_v39  ;;  %v712_v49 = vrot.slane %v711_v43, 1  ;;  %v1291_v50 = vadd.f32 %v1283_v16, %v1242_v46 }
 0x253   :  { %2116 = vpow2.f32 %v722_v38  ;;  %v1312_v51 = vmax.f32 %v1310_v27, %v1311_v44  ;;  %v1317_v24 = vsel %vm685_vm0, %v2599_v45, -inf  ;;  %v1302_v52 = vsel %vm1294_vm10, %v1290_v28, %v1298_v47 }
 0x254   :  { %v713_v55 = vmax.f32 %v711_v43, %v712_v49  ;;  %v1318_v57 = vrot.slane %v1317_v24, 4  ;;  %v2605_v58 = vadd.f32 %v2505_v19, %v1302_v52  ;;  %vm1295_vm11 = vcmp.ge.f32.partialorder %v1291_v50, 0.0 }
 0x255   :  { %v1313_v4 = vrot.slane %v1312_v51, 2  ;;  %v1299_v5 = vmul.f32 0.2, %v1291_v50  ;;  %v792_v9 = vrot.slane %v778_v29, %v2462_v53  ;;  %v793_v17 = vcombine.high %v785_v63, %v785_v63 }
 0x256   :  { %v717_v16 = vsub.f32 %v2576_v30, %v713_v55  ;;  %v1319_v6 = vmax.f32 %v1317_v24, %v1318_v57  ;;  %v1324_v15 = vsel %vm685_vm0, %v2605_v58, -inf  ;;  %v720_v13 = vmul.f32 1.442695, %v715_v48 }
 0x257   :  { %v1314_v20 = vmax.f32 %v1312_v51, %v1313_v4  ;;  %v1325_v22 = vrot.slane %v1324_v15, 4  ;;  %v1303_v25 = vsel %vm1295_vm11, %v1291_v50, %v1299_v5  ;;  %v794_v28 = vcombine.high %v792_v9, %v792_v9 }
 0x258   :  { %v724_v27 = vmul.f32 1.442695, %v717_v16  ;;  %v1320_v56 = vrot.slane %v1319_v6, 2  ;;  %v2613_v62 = vadd.f32 %v2505_v19, %v1303_v25  ;;  %v1617_v29 = vrot.slane %v1601_v59, %v2451_v23 }
 0x259   :  { %v1315_v34 = vrot.slane %v1314_v20, 1  ;;  %v1326_v38 = vmax.f32 %v1324_v15, %v1325_v22  ;;  %v2620_v30 = vrot.slane %v1600_v37, %v2451_v23  ;;  %v2625_v44 = vrot.slane %v785_v63, %v2451_v23 }
 0x25a   :  { %v1321_v39 = vmax.f32 %v1319_v6, %v1320_v56  ;;  %v1331_v43 = vsel %vm685_vm0, %v2613_v62, -inf  ;;  %v2628_v19 = vrot.slane %v792_v9, %v2451_v23  ;;  %2118 = vpow2.f32 %v720_v13 }
 0x25b   :  { %v1316_v47 = vmax.f32 %v1314_v20, %v1315_v34  ;;  %v1327_v46 = vrot.slane %v1326_v38, 2  ;;  %v1332_v59 = vrot.slane %v1331_v43, 4  ;;  %2120 = vpow2.f32 %v724_v27 }
 0x25c   :  { %v2115_v48 = vpop.eup %2114  ;;  %v1322_v49 = vrot.slane %v1321_v39, 1  ;;  %v2631_v37 = vrot.slane %v793_v17, %v2451_v23  ;;  %v2634_v50 = vrot.slane %v794_v28, %v2451_v23 }
 0x25d   :  { %v2117_v51 = vpop.eup %2116  ;;  %v1338_v24 = vsub.f32 %v2590_v12, %v1316_v47  ;;  %v1328_v52 = vmax.f32 %v1326_v38, %v1327_v46  ;;  %v1333_v55 = vmax.f32 %v1331_v43, %v1332_v59  ;;  %v932_v57 = vpop.permute.xlu1 %931  ;;  %v2638_v4 = vmul.f32 %v2115_v48, %v2467_v60 }
 0x25e   :  { %v1576_v63 = vpop.permute.xlu0 %1575  ;;  %v1323_v5 = vmax.f32 %v1321_v39, %v1322_v49  ;;  %v999_v9 = vadd.f32 %v982_v1, %v932_v57  ;;  %v2644_v6 = vmul.f32 %v2117_v51, %v2467_v60 }
 0x25f   :  { %v1625_v16 = vadd.f32 %v1617_v29, %v1576_v63  ;;  %v1342_v15 = vmul.f32 1.442695, %v1338_v24  ;;  %v1329_v17 = vrot.slane %v1328_v52, 1  ;;  %v1334_v13 = vrot.slane %v1333_v55, 2 }
 0x260   :  { %v730_v12 = vsel %vm685_vm0, %v2638_v4, 0.0  ;;  %v1339_v20 = vsub.f32 %v2599_v45, %v1323_v5  ;;  %vm1003_vm12 = vcmp.ge.f32.partialorder %v999_v9, 0.0  ;;  %v1007_v22 = vmul.f32 0.2, %v999_v9 }
 0x261   :  { %vm1629_vm13 = vcmp.ge.f32.partialorder %v1625_v16, 0.0  ;;  %2122 = vpow2.f32 %v1342_v15  ;;  %v1330_v25 = vmax.f32 %v1328_v52, %v1329_v17  ;;  %v1335_v27 = vmax.f32 %v1333_v55, %v1334_v13  ;;  %v939_v1 = vpop.permute.xlu1 %938 }
 0x262   :  { %v1633_v2 = vmul.f32 0.2, %v1625_v16  ;;  %v1344_v56 = vmul.f32 1.442695, %v1339_v20  ;;  %v1011_v28 = vsel %vm1003_vm12, %v999_v9, %v1007_v22  ;;  %v1000_v34 = vadd.f32 %v986_v31, %v939_v1 }
 0x263   :  { %v731_v38 = vrot.slane %v730_v12, 4  ;;  %v1340_v29 = vsub.f32 %v2605_v58, %v1330_v25  ;;  %v1336_v39 = vrot.slane %v1335_v27, 1  ;;  %v2654_v45 = vadd.f32 %v2526_v40, %v1011_v28 }
 0x264   :  { %v1637_v43 = vsel %vm1629_vm13, %v1625_v16, %v1633_v2  ;;  %2124 = vpow2.f32 %v1344_v56  ;;  %vm1004_vm14 = vcmp.ge.f32.partialorder %v1000_v34, 0.0  ;;  %v1008_v46 = vmul.f32 0.2, %v1000_v34  ;;  %v2119_v59 = vpop.eup %2118 }
 0x265   :  { %v2657_v47 = vadd.f32 %v2528_v41, %v1637_v43  ;;  %v1346_v48 = vmul.f32 1.442695, %v1340_v29  ;;  %v1337_v49 = vmax.f32 %v1335_v27, %v1336_v39  ;;  %v1021_v3 = vsel %vm685_vm0, %v2654_v45, -inf  ;;  %v946_v31 = vpop.permute.xlu1 %945  ;;  %v2661_v58 = vpop.eup %2120 }
 0x266   :  { %v732_v51 = vadd.f32 %v731_v38, %v730_v12  ;;  %v1022_v24 = vrot.slane %v1021_v3, 4  ;;  %v1012_v55 = vsel %vm1004_vm14, %v1000_v34, %v1008_v46  ;;  %v1001_v57 = vadd.f32 %v2517_v32, %v946_v31 }
 0x267   :  { %v1665_v52 = vsel %vm685_vm0, %v2657_v47, -inf  ;;  %2126 = vpow2.f32 %v1346_v48  ;;  %v1341_v63 = vsub.f32 %v2613_v62, %v1337_v49  ;;  %v2668_v9 = vadd.f32 %v2526_v40, %v1012_v55 }
 0x268   :  { %v1666_v5 = vrot.slane %v1665_v52, 4  ;;  %v1023_v16 = vmax.f32 %v1021_v3, %v1022_v24  ;;  %vm1005_vm15 = vcmp.ge.f32.partialorder %v1001_v57, 0.0  ;;  %v1009_v15 = vmul.f32 0.2, %v1001_v57 }
 0x269   :  { %v733_v17 = vrot.slane %v732_v51, 2  ;;  %v1348_v13 = vmul.f32 1.442695, %v1341_v63  ;;  %v1028_v20 = vsel %vm685_vm0, %v2668_v9, -inf  ;;  %v953_v22 = vpop.permute.xlu1 %952  ;;  %v2673_v25 = vmul.f32 %v2119_v59, %v2467_v60 }
 0x26a   :  { %v1667_v12 = vmax.f32 %v1665_v52, %v1666_v5  ;;  %v1024_v32 = vrot.slane %v1023_v16, 2  ;;  %v1029_v27 = vrot.slane %v1028_v20, 4  ;;  %v1013_v62 = vsel %vm1005_vm15, %v1001_v57, %v1009_v15  ;;  %v2695_v5 = vpop.f32.mrb[0].mxu0 }
 0x26b   :  { %v1002_v2 = vadd.f32 %v2520_v33, %v953_v22  ;;  %v2676_v1 = vpop.eup %2122  ;;  %2128 = vpow2.f32 %v1348_v13  ;;  %v2679_v28 = vadd.f32 %v2526_v40, %v1013_v62  ;;  %v734_v34 = vadd.f32 %v733_v17, %v732_v51 }
 0x26c   :  { %v1668_v56 = vrot.slane %v1667_v12, 2  ;;  %v1025_v38 = vmax.f32 %v1023_v16, %v1024_v32  ;;  %v1030_v29 = vmax.f32 %v1028_v20, %v1029_v27  ;;  %v2685_v33 = vsel %vm685_vm0, %v2673_v25, 0.0 }
 0x26d   :  { %vm1006_vm1 = vcmp.ge.f32.partialorder %v1002_v2, 0.0  ;;  %v1010_v39 = vmul.f32 0.2, %v1002_v2  ;;  %v1035_v46 = vsel %vm685_vm0, %v2679_v28, -inf  ;;  %v1555_v59 = vpop.permute.xlu1 %1554  ;;  %v735_v48 = vrot.slane %v734_v34, 1 }
 0x26e   :  { %v1669_v43 = vmax.f32 %v1667_v12, %v1668_v56  ;;  %v2687_v49 = vpop.eup %2124  ;;  %v1026_v3 = vrot.slane %v1025_v38, 1  ;;  %v1031_v31 = vrot.slane %v1030_v29, 2  ;;  %v1036_v24 = vrot.slane %v1035_v46, 4  ;;  %v2698_v12 = vpop.f32.mrb[1].mxu0 }
 0x26f   :  { %v1014_v51 = vsel %vm1006_vm1, %v1002_v2, %v1010_v39  ;;  %v1622_v57 = vadd.f32 %v1605_v35, %v1555_v59  ;;  %v736_v63 = vadd.f32 %v735_v48, %v734_v34  ;;  %v738_v13 = vrot.slane %v2685_v33, 4  ;;  %v280_v39 = vpop.f32.mrb[2].mxu0 }
 0x270   :  { %v1670_v52 = vrot.slane %v1669_v43, 1  ;;  %v2690_v55 = vadd.f32 %v2526_v40, %v1014_v51  ;;  %v1027_v16 = vmax.f32 %v1025_v38, %v1026_v3  ;;  %v1032_v15 = vmax.f32 %v1030_v29, %v1031_v31  ;;  %v281_v3 = vpop.f32.mrb[3].mxu0 }
 0x271   :  { %v1037_v17 = vmax.f32 %v1035_v46, %v1036_v24  ;;  %v2700_v20 = vpop.eup %2126  ;;  %vm1626_vm2 = vcmp.ge.f32.partialorder %v1622_v57, 0.0  ;;  %v1630_v32 = vmul.f32 0.2, %v1622_v57  ;;  %v1562_v14 = vpop.permute.xlu1 %1561  ;;  %v758_v29 = vmax.f32 %v736_v63, 1e-30 }
 0x272   :  { %v1671_v22 = vmax.f32 %v1669_v43, %v1670_v52  ;;  %v1042_v40 = vsel %vm685_vm0, %v2690_v55, -inf  ;;  %v1049_v35 = vsub.f32 %v2654_v45, %v1027_v16  ;;  %v1033_v27 = vrot.slane %v1032_v15, 1 }
 0x273   :  { %v1038_v62 = vrot.slane %v1037_v17, 2  ;;  %v1043_v2 = vrot.slane %v1042_v40, 4  ;;  %v1634_v34 = vsel %vm1626_vm2, %v1622_v57, %v1630_v32  ;;  %v1623_v38 = vadd.f32 %v1609_v18, %v1562_v14 }
 0x274   :  { %v1675_v56 = vsub.f32 %v2657_v47, %v1671_v22  ;;  %v1053_v43 = vmul.f32 1.442695, %v1049_v35  ;;  %v1034_v46 = vmax.f32 %v1032_v15, %v1033_v27  ;;  %v2712_v24 = vadd.f32 %v2528_v41, %v1634_v34 }
 0x275   :  { %v1039_v59 = vmax.f32 %v1037_v17, %v1038_v62  ;;  %v1044_v48 = vmax.f32 %v1042_v40, %v1043_v2  ;;  %v2709_v31 = vpop.eup %2128  ;;  %vm1627_vm3 = vcmp.ge.f32.partialorder %v1623_v38, 0.0  ;;  %v1631_v47 = vmul.f32 0.2, %v1623_v38  ;;  %v1569_v51 = vpop.permute.xlu1 %1568 }
 0x276   :  { %v1682_v45 = vmul.f32 1.442695, %v1675_v56  ;;  %2130 = vpow2.f32 %v1053_v43  ;;  %v1050_v26 = vsub.f32 %v2668_v9, %v1034_v46  ;;  %v1644_v57 = vsel %vm685_vm0, %v2712_v24, -inf }
 0x277   :  { %v1040_v18 = vrot.slane %v1039_v59, 1  ;;  %v1045_v52 = vrot.slane %v1044_v48, 2  ;;  %v1635_v63 = vsel %vm1627_vm3, %v1623_v38, %v1631_v47  ;;  %v1624_v16 = vadd.f32 %v2620_v30, %v1569_v51 }
 0x278   :  { %2132 = vpow2.f32 %v1682_v45  ;;  %v1055_v15 = vmul.f32 1.442695, %v1050_v26  ;;  %v1645_v40 = vrot.slane %v1644_v57, 4  ;;  %v2719_v32 = vadd.f32 %v2528_v41, %v1635_v63 }
 0x279   :  { %v1041_v17 = vmax.f32 %v1039_v59, %v1040_v18  ;;  %v1046_v22 = vmax.f32 %v1044_v48, %v1045_v52  ;;  %vm1628_vm4 = vcmp.ge.f32.partialorder %v1624_v16, 0.0  ;;  %v1632_v14 = vmul.f32 0.2, %v1624_v16 }
 0x27a   :  { %2134 = vrcp.f32 %v758_v29  ;;  %v1646_v27 = vmax.f32 %v1644_v57, %v1645_v40  ;;  %v1651_v62 = vsel %vm685_vm0, %v2719_v32, -inf  ;;  %v739_v30 = vadd.f32 %v738_v13, %v2685_v33 }
 0x27b   :  { %2136 = vpow2.f32 %v1055_v15  ;;  %v1051_v9 = vsub.f32 %v2679_v28, %v1041_v17  ;;  %v1047_v35 = vrot.slane %v1046_v22, 1  ;;  %v1636_v2 = vsel %vm1628_vm4, %v1624_v16, %v1632_v14 }
 0x27c   :  { %v744_v56 = vsel %vm685_vm0, %v2644_v6, 0.0  ;;  %v1647_v39 = vrot.slane %v1646_v27, 2  ;;  %v1652_v43 = vrot.slane %v1651_v62, 4  ;;  %v2728_v29 = vadd.f32 %v2528_v41, %v1636_v2 }
 0x27d   :  { %v1057_v34 = vmul.f32 1.442695, %v1051_v9  ;;  %v1048_v38 = vmax.f32 %v1046_v22, %v1047_v35  ;;  %v740_v46 = vrot.slane %v739_v30, 2  ;;  %v745_v28 = vrot.slane %v744_v56, 4 }
 0x27e   :  { %v2732_v59 = vmul.f32 %v2661_v58, %v2467_v60  ;;  %v1648_v33 = vmax.f32 %v1646_v27, %v1647_v39  ;;  %v1653_v13 = vmax.f32 %v1651_v62, %v1652_v43  ;;  %v1658_v3 = vsel %vm685_vm0, %v2728_v29, -inf }
 0x27f   :  { %2138 = vpow2.f32 %v1057_v34  ;;  %v1052_v48 = vsub.f32 %v2690_v55, %v1048_v38  ;;  %v741_v45 = vadd.f32 %v740_v46, %v739_v30  ;;  %v746_v47 = vadd.f32 %v745_v28, %v744_v56 }
 0x280   :  { %v751_v41 = vsel %vm685_vm0, %v2732_v59, 0.0  ;;  %v2131_v51 = vpop.eup %2130  ;;  %v1649_v18 = vrot.slane %v1648_v33, 1  ;;  %v1654_v52 = vrot.slane %v1653_v13, 2  ;;  %v1659_v57 = vrot.slane %v1658_v3, 4 }
 0x281   :  { %v1059_v26 = vmul.f32 1.442695, %v1052_v48  ;;  %v742_v58 = vrot.slane %v741_v45, 1  ;;  %v747_v63 = vrot.slane %v746_v47, 2  ;;  %v752_v55 = vrot.slane %v751_v41, 4 }
 0x282   :  { %v2739_v60 = vpop.eup %2132  ;;  %v2742_v16 = vmul.f32 %v2131_v51, %v2489_v10  ;;  %v1650_v15 = vmax.f32 %v1648_v33, %v1649_v18  ;;  %v1655_v17 = vmax.f32 %v1653_v13, %v1654_v52  ;;  %v1660_v22 = vmax.f32 %v1658_v3, %v1659_v57 }
 0x283   :  { %2140 = vpow2.f32 %v1059_v26  ;;  %v743_v14 = vadd.f32 %v742_v58, %v741_v45  ;;  %v748_v9 = vadd.f32 %v747_v63, %v746_v47  ;;  %v753_v35 = vadd.f32 %v752_v55, %v751_v41 }
 0x284   :  { %v2135_v40 = vpop.eup %2134  ;;  %v1065_v27 = vsel %vm685_vm0, %v2742_v16, 0.0  ;;  %v1672_v2 = vsub.f32 %v2712_v24, %v1650_v15  ;;  %v1656_v30 = vrot.slane %v1655_v17, 1  ;;  %v1661_v56 = vrot.slane %v1660_v22, 2 }
 0x285   :  { %v2137_v62 = vpop.eup %2136  ;;  %v763_v34 = vmul.f32 %v2135_v40, %v2638_v4  ;;  %v759_v38 = vmax.f32 %v743_v14, 1e-30  ;;  %v749_v39 = vrot.slane %v748_v9, 1  ;;  %v754_v43 = vrot.slane %v753_v35, 2 }
 0x286   :  { %v1066_v46 = vrot.slane %v1065_v27, 4  ;;  %v1676_v28 = vmul.f32 1.442695, %v1672_v2  ;;  %v1657_v48 = vmax.f32 %v1655_v17, %v1656_v30  ;;  %v1662_v33 = vmax.f32 %v1660_v22, %v1661_v56 }
 0x287   :  { %819 = vxpose.xlu1.b32.start [1/4] (short) (narrow) %v763_v34, 8  ;;  %v2749_v13 = vmul.f32 %v2137_v62, %v2489_v10  ;;  %2142 = vrcp.f32 %v759_v38  ;;  %v750_v3 = vadd.f32 %v749_v39, %v748_v9  ;;  %v755_v45 = vadd.f32 %v754_v43, %v753_v35 }
 0x288   :  { %v1067_v47 = vadd.f32 %v1066_v46, %v1065_v27  ;;  %2144 = vpow2.f32 %v1676_v28  ;;  %v1673_v41 = vsub.f32 %v2719_v32, %v1657_v48  ;;  %v1663_v4 = vrot.slane %v1662_v33, 1  ;;  %v424_v46 = vpop.f32.mrb[4].mxu0 }
 0x289   :  { %v2139_v24 = vpop.eup %2138  ;;  %v1072_v51 = vsel %vm685_vm0, %v2749_v13, 0.0  ;;  %v760_v26 = vmax.f32 %v750_v3, 1e-30  ;;  %v756_v18 = vrot.slane %v755_v45, 1  ;;  %v2759_v15 = vmul.f32 %v2676_v1, %v2472_v61 }
 0x28a   :  { %v1068_v52 = vrot.slane %v1067_v47, 2  ;;  %v1073_v57 = vrot.slane %v1072_v51, 4  ;;  %v1678_v58 = vmul.f32 1.442695, %v1673_v41  ;;  %v1664_v63 = vmax.f32 %v1662_v33, %v1663_v4 }
 0x28b   :  { %v2755_v55 = vmul.f32 %v2139_v24, %v2489_v10  ;;  %2146 = vrcp.f32 %v760_v26  ;;  %v757_v17 = vadd.f32 %v756_v18, %v755_v45  ;;  %v1354_v35 = vsel %vm685_vm0, %v2759_v15, 0.0 }
 0x28c   :  { %v1069_v32 = vadd.f32 %v1068_v52, %v1067_v47  ;;  %v1074_v22 = vadd.f32 %v1073_v57, %v1072_v51  ;;  %2148 = vpow2.f32 %v1678_v58  ;;  %v1674_v14 = vsub.f32 %v2728_v29, %v1664_v63 }
 0x28d   :  { %v2141_v40 = vpop.eup %2140  ;;  %v1079_v9 = vsel %vm685_vm0, %v2755_v55, 0.0  ;;  %v761_v27 = vmax.f32 %v757_v17, 1e-30  ;;  %v1355_v34 = vrot.slane %v1354_v35, 4  ;;  %v2771_v38 = vmul.f32 %v2687_v49, %v2472_v61 }
 0x28e   :  { %v1070_v62 = vrot.slane %v1069_v32, 1  ;;  %v1075_v2 = vrot.slane %v1074_v22, 2  ;;  %v1080_v30 = vrot.slane %v1079_v9, 4  ;;  %v1680_v1 = vmul.f32 1.442695, %v1674_v14 }
 0x28f   :  { %v2767_v56 = vmul.f32 %v2141_v40, %v2489_v10  ;;  %2150 = vrcp.f32 %v761_v27  ;;  %v1356_v48 = vadd.f32 %v1355_v34, %v1354_v35  ;;  %v1361_v33 = vsel %vm685_vm0, %v2771_v38, 0.0  ;;  %v425_v10 = vpop.f32.mrb[5].mxu0 }
 0x290   :  { %v1071_v29 = vadd.f32 %v1070_v62, %v1069_v32  ;;  %v1076_v39 = vadd.f32 %v1075_v2, %v1074_v22  ;;  %v1081_v43 = vadd.f32 %v1080_v30, %v1079_v9  ;;  %2152 = vpow2.f32 %v1680_v1  ;;  %v2790_v1 = vpop.f32.mrb[6].mxu0 }
 0x291   :  { %v1086_v28 = vsel %vm685_vm0, %v2767_v56, 0.0  ;;  %v2143_v3 = vpop.eup %2142  ;;  %v1357_v51 = vrot.slane %v1356_v48, 2  ;;  %v1362_v26 = vrot.slane %v1361_v33, 4  ;;  %v2780_v18 = vmul.f32 %v2700_v20, %v2472_v61 }
 0x292   :  { %v1093_v45 = vmax.f32 %v1071_v29, 1e-30  ;;  %v1077_v47 = vrot.slane %v1076_v39, 1  ;;  %v1082_v24 = vrot.slane %v1081_v43, 2  ;;  %v1087_v49 = vrot.slane %v1086_v28, 4  ;;  %v2145_v41 = vpop.eup %2144 }
 0x293   :  { %v765_v4 = vmul.f32 %v2143_v3, %v2673_v25  ;;  %v1358_v63 = vadd.f32 %v1357_v51, %v1356_v48  ;;  %v2783_v17 = vmul.f32 %v2145_v41, %v2494_v11  ;;  %v1363_v32 = vadd.f32 %v1362_v26, %v1361_v33 }
 0x294   :  { %2154 = vrcp.f32 %v1093_v45  ;;  %v1078_v52 = vadd.f32 %v1077_v47, %v1076_v39  ;;  %v1083_v57 = vadd.f32 %v1082_v24, %v1081_v43  ;;  %v1088_v58 = vadd.f32 %v1087_v49, %v1086_v28  ;;  %v2792_v43 = vpop.f32.mrb[7].mxu0 }
 0x295   :  { %820 = vxpose.xlu1.b32.cont [2/4] (short) (narrow) %v765_v4, 8  ;;  %v1368_v22 = vsel %vm685_vm0, %v2780_v18, 0.0  ;;  %v2147_v25 = vpop.eup %2146  ;;  %v1359_v62 = vrot.slane %v1358_v63, 1  ;;  %v1688_v2 = vsel %vm685_vm0, %v2783_v17, 0.0  ;;  %v1364_v30 = vrot.slane %v1363_v32, 2 }
 0x296   :  { %v1094_v40 = vmax.f32 %v1078_v52, 1e-30  ;;  %v1084_v14 = vrot.slane %v1083_v57, 1  ;;  %v1089_v9 = vrot.slane %v1088_v58, 2  ;;  %v1369_v35 = vrot.slane %v1368_v22, 4  ;;  %v2149_v20 = vpop.eup %2148 }
 0x297   :  { %v767_v27 = vmul.f32 %v2147_v25, %v2644_v6  ;;  %v1689_v39 = vrot.slane %v1688_v2, 4  ;;  %v1360_v46 = vadd.f32 %v1359_v62, %v1358_v63  ;;  %v1365_v28 = vadd.f32 %v1364_v30, %v1363_v32 }
 0x298   :  { %2156 = vrcp.f32 %v1094_v40  ;;  %v1085_v34 = vadd.f32 %v1084_v14, %v1083_v57  ;;  %v1090_v29 = vadd.f32 %v1089_v9, %v1088_v58  ;;  %v2795_v48 = vmul.f32 %v2149_v20, %v2494_v11 }
 0x299   :  { %821 = vxpose.xlu1.b32.cont [3/4] (short) (narrow) %v767_v27, 8  ;;  %v1370_v6 = vadd.f32 %v1369_v35, %v1368_v22  ;;  %v2151_v33 = vpop.eup %2150  ;;  %v1690_v45 = vadd.f32 %v1689_v39, %v1688_v2  ;;  %v2799_v47 = vmul.f32 %v2709_v31, %v2472_v61  ;;  %v1382_v41 = vmax.f32 %v1360_v46, 1e-30 }
 0x29a   :  { %v1095_v10 = vmax.f32 %v1085_v34, 1e-30  ;;  %v1091_v3 = vrot.slane %v1090_v29, 1  ;;  %v2153_v24 = vpop.eup %2152  ;;  %v769_v49 = vmul.f32 %v2151_v33, %v2732_v59  ;;  %v1366_v4 = vrot.slane %v1365_v28, 1 }
 0x29b   :  { %v1695_v51 = vsel %vm685_vm0, %v2795_v48, 0.0  ;;  %v1691_v52 = vrot.slane %v1690_v45, 2  ;;  %v1371_v63 = vrot.slane %v1370_v6, 2  ;;  %v2805_v32 = vmul.f32 %v2153_v24, %v2494_v11 }
 0x29c   :  { %2158 = vrcp.f32 %v1095_v10  ;;  %v1092_v26 = vadd.f32 %v1091_v3, %v1090_v29  ;;  %v1696_v57 = vrot.slane %v1695_v51, 4  ;;  %v1367_v58 = vadd.f32 %v1366_v4, %v1365_v28 }
 0x29d   :  { %822 = vxpose.xlu1.b32.end [4/4] (short) (narrow) %v769_v49, 8  ;;  %2160 = vrcp.f32 %v1382_v41  ;;  %v1692_v22 = vadd.f32 %v1691_v52, %v1690_v45  ;;  %v1375_v25 = vsel %vm685_vm0, %v2799_v47, 0.0  ;;  %v1372_v9 = vadd.f32 %v1371_v63, %v1370_v6 }
 0x29e   :  { %v2155_v61 = vpop.eup %2154  ;;  %v1096_v31 = vmax.f32 %v1092_v26, 1e-30  ;;  %v1697_v59 = vadd.f32 %v1696_v57, %v1695_v51  ;;  %v1383_v14 = vmax.f32 %v1367_v58, 1e-30  ;;  %v1702_v35 = vsel %vm685_vm0, %v2805_v32, 0.0 }
 0x29f   :  { %v1098_v40 = vmul.f32 %v2155_v61, %v2742_v16  ;;  %v1693_v20 = vrot.slane %v1692_v22, 1  ;;  %v1703_v62 = vrot.slane %v1702_v35, 4  ;;  %v1373_v2 = vrot.slane %v1372_v9, 1 }
 0x2a0   :  { %2162 = vrcp.f32 %v1096_v31  ;;  %v1698_v27 = vrot.slane %v1697_v59, 2  ;;  %v1376_v30 = vrot.slane %v1375_v25, 4  ;;  %v2814_v34 = vmul.f32 %v2739_v60, %v2494_v11 }
 0x2a1   :  { %1109 = vxpose.xlu0.b32.start [1/4] (short) (narrow) %v1098_v40, 8  ;;  %2164 = vrcp.f32 %v1383_v14  ;;  %v1694_v39 = vadd.f32 %v1693_v20, %v1692_v22  ;;  %v1704_v46 = vadd.f32 %v1703_v62, %v1702_v35  ;;  %v815_v28 = vmul.f32 %v2625_v44, %v2698_v12 }
 0x2a2   :  { %v2157_v29 = vpop.eup %2156  ;;  %v1699_v16 = vadd.f32 %v1698_v27, %v1697_v59  ;;  %v1374_v33 = vadd.f32 %v1373_v2, %v1372_v9  ;;  %v1377_v10 = vadd.f32 %v1376_v30, %v1375_v25  ;;  %v1709_v3 = vsel %vm685_vm0, %v2814_v34, 0.0 }
 0x2a3   :  { %v1100_v6 = vmul.f32 %v2157_v29, %v2749_v13  ;;  %v1716_v45 = vmax.f32 %v1694_v39, 1e-30  ;;  %v1705_v49 = vrot.slane %v1704_v46, 2  ;;  %v1710_v41 = vrot.slane %v1709_v3, 4 }
 0x2a4   :  { %v1700_v24 = vrot.slane %v1699_v16, 1  ;;  %v1384_v11 = vmax.f32 %v1374_v33, 1e-30  ;;  %v1378_v60 = vrot.slane %v1377_v10, 2  ;;  %v816_v4 = vmul.f32 %v2628_v19, %v2698_v12 }
 0x2a5   :  { %1110 = vxpose.xlu0.b32.cont [2/4] (short) (narrow) %v1100_v6, 8  ;;  %v817_v51 = vmul.f32 %v2631_v37, %v2698_v12  ;;  %2166 = vrcp.f32 %v1716_v45  ;;  %v1706_v52 = vadd.f32 %v1705_v49, %v1704_v46  ;;  %v1711_v57 = vadd.f32 %v1710_v41, %v1709_v3 }
 0x2a6   :  { %v2159_v26 = vpop.eup %2158  ;;  %v1701_v13 = vadd.f32 %v1700_v24, %v1699_v16  ;;  %v1379_v61 = vadd.f32 %v1378_v60, %v1377_v10  ;;  %v818_v31 = vmul.f32 %v2634_v50, %v2698_v12  ;;  %2168 = vrcp.f32 %v1384_v11 }
 0x2a7   :  { %v2161_v58 = vpop.eup %2160  ;;  %v1102_v63 = vmul.f32 %v2159_v26, %v2755_v55  ;;  %v1707_v59 = vrot.slane %v1706_v52, 1  ;;  %v1712_v25 = vrot.slane %v1711_v57, 2  ;;  %v2077_v14 = vpack.c.bf16 %v816_v4, %v815_v28 }
 0x2a8   :  { %v1717_v22 = vmax.f32 %v1701_v13, 1e-30  ;;  %v1380_v40 = vrot.slane %v1379_v61, 1  ;;  %v2080_v27 = vpack.c.bf16 %v818_v31, %v817_v51  ;;  %vm2331_vm0 = vmmov 0  }
 0x2a9   :  { %1111 = vxpose.xlu0.b32.cont [3/4] (short) (narrow) %v1102_v63, 8  ;;  %v1708_v35 = vadd.f32 %v1707_v59, %v1706_v52  ;;  %v1713_v20 = vadd.f32 %v1712_v25, %v1711_v57  ;;  %1912 = vmatprep.mubr.msk.f32.mxu0 %vm2331_vm0, %v2328_v0  ;;  %v1105_v2 = vmul.f32 %v2625_v44, %v2792_v43  ;;  %v583_v60 = vmul.u32 6, %v2446_v21 }
 0x2aa   :  { %v2163_v9 = vpop.eup %2162  ;;  %2170 = vrcp.f32 %v1717_v22  ;;  %1923 = vmatprep.mubr.msk.f32.mxu1 %vm2331_vm0, %v2328_v0  ;;  %v1381_v62 = vadd.f32 %v1380_v40, %v1379_v61  ;;  %2078 = vmatpush3.bf16.msra.mxu0 %v2077_v14  ;;  %v1106_v30 = vmul.f32 %v2628_v19, %v2792_v43  ;;  %v1107_v16 = vmul.f32 %v2631_v37, %v2792_v43 }
 0x2ab   :  { %v2165_v12 = vpop.eup %2164  ;;  %v1104_v55 = vmul.f32 %v2163_v9, %v2767_v56  ;;  %v1718_v29 = vmax.f32 %v1708_v35, 1e-30  ;;  %v1714_v39 = vrot.slane %v1713_v20, 1  ;;  %2079 = vmatprep.subr.bf16.mxu0 %v2330_v54  ;;  %v1108_v56 = vmul.f32 %v2634_v50, %v2792_v43 }
 0x2ac   :  { %v1385_v46 = vmax.f32 %v1381_v62, 1e-30  ;;  %v2083_v28 = vpack.c.bf16 %v1106_v30, %v1105_v2  ;;  %v1387_v44 = vmul.f32 %v2161_v58, %v2759_v15  ;;  %v1389_v43 = vmul.f32 %v2165_v12, %v2771_v38 }
 0x2ad   :  { %1112 = vxpose.xlu0.b32.end [4/4] (short) (narrow) %v1104_v55, 8  ;;  %2172 = vrcp.f32 %v1718_v29  ;;  %v1715_v6 = vadd.f32 %v1714_v39, %v1713_v20  ;;  %v2086_v19 = vpack.c.bf16 %v1108_v56, %v1107_v16  ;;  %vm584_vm5 = vcmp.ge.s32.totalorder %v2484_v7, %v583_v60 }
 0x2ae   :  { %2174 = vrcp.f32 %v1385_v46  ;;  %2081 = vmatpush3.bf16.msra.mxu0 %v2080_v27  ;;  %2084 = vmatpush3.bf16.msra.mxu1 %v2083_v28 }
 0x2af   :  { %v2167_v33 = vpop.eup %2166  ;;  %v1719_v10 = vmax.f32 %v1715_v6, 1e-30  ;;  %2088 = vmatprep.subr.bf16.mxu0 %v2330_v54  ;;  %2085 = vmatprep.subr.bf16.mxu1 %v2330_v54 }
 0x2b0   :  { %v1721_v37 = vmul.f32 %v2167_v33, %v2783_v17  ;;  %v2169_v50 = vpop.eup %2168 }
 0x2b1   :  { %1443 = vxpose.xlu0.b32.start [1/4] (short) (narrow) %v1387_v44, 8  ;;  %2176 = vrcp.f32 %v1719_v10  ;;  %v1391_v45 = vmul.f32 %v2169_v50, %v2780_v18 }
 0x2b2   :  { %1732 = vxpose.xlu1.b32.start [1/4] (short) (narrow) %v1721_v37, 8  ;;  %2087 = vmatpush3.bf16.msra.mxu1 %v2086_v19 }
 0x2b3   :  { %2094 = vmatprep.subr.bf16.mxu1 %v2330_v54 }
 0x2b4   :  { %v2171_v15 = vpop.eup %2170 }
 0x2b5   :  { %1444 = vxpose.xlu0.b32.cont [2/4] (short) (narrow) %v1389_v43, 8  ;;  %v1723_v3 = vmul.f32 %v2171_v15, %v2795_v48  ;;  %v585_v48 = vmul.u32 6, %v2487_v8 }
 0x2b7   :  { %1733 = vxpose.xlu1.b32.cont [2/4] (short) (narrow) %v1723_v3, 8  ;;  %v2173_v24 = vpop.eup %2172  ;;  %vm586_vm6 = vcmp.lt.s32.totalorder %v2484_v7, %v585_v48 }
 0x2b8   :  { %v2175_v49 = vpop.eup %2174  ;;  %v1725_v17 = vmul.f32 %v2173_v24, %v2805_v32  ;;  %vm587_vm7 = vmand %vm584_vm5, %vm586_vm6 }
 0x2b9   :  { %1445 = vxpose.xlu0.b32.cont [3/4] (short) (narrow) %v1391_v45, 8  ;;  %v1393_v41 = vmul.f32 %v2175_v49, %v2799_v47  ;;  %v588_v18 = vsel %vm587_vm7, 1.0, %v2328_v0 }
 0x2ba   :  { %v1401_v32 = vrot.slane %v588_v18, %v2462_v53 }
 0x2bb   :  { %1734 = vxpose.xlu1.b32.cont [3/4] (short) (narrow) %v1725_v17, 8  ;;  %v2177_v11 = vpop.eup %2176 }
 0x2bc   :  { %v1727_v38 = vmul.f32 %v2177_v11, %v2814_v34  ;;  %v1402_v4 = vcombine.high %v1401_v32, %v1401_v32  ;;  %v1409_v47 = vrot.slane %v1401_v32, %v2462_v53 }
 0x2bd   :  { %1446 = vxpose.xlu0.b32.end [4/4] (short) (narrow) %v1393_v41, 8 }
 0x2be   :  { %v1416_v51 = vrot.slane %v1402_v4, %v2462_v53  ;;  %v1417_v34 = vcombine.high %v1409_v47, %v1409_v47  ;;  %v1422_v21 = vrot.slane %v1409_v47, %v2451_v23 }
 0x2bf   :  { %1735 = vxpose.xlu1.b32.end [4/4] (short) (narrow) %v1727_v38, 8 }
 0x2c0   :  { %v1418_v26 = vcombine.high %v1416_v51, %v1416_v51  ;;  %v1426_v8 = vrot.slane %v1416_v51, %v2451_v23  ;;  %v1430_v13 = vrot.slane %v1417_v34, %v2451_v23  ;;  %v1439_v52 = vmul.f32 %v1422_v21, %v2435_v36 }
 0x2c1   :  { %v1728_v31 = vmul.f32 %v1422_v21, %v2437_v42 }
 0x2c2   :  { %v1434_v7 = vrot.slane %v1418_v26, %v2451_v23  ;;  %v1440_v57 = vmul.f32 %v1426_v8, %v2435_v36  ;;  %v1441_v58 = vmul.f32 %v1430_v13, %v2435_v36  ;;  %v1729_v22 = vmul.f32 %v1426_v8, %v2437_v42 }
 0x2c3   :  { %v1730_v59 = vmul.f32 %v1430_v13, %v2437_v42 }
 0x2c4   :  { %v1442_v63 = vmul.f32 %v1434_v7, %v2435_v36  ;;  %v2089_v61 = vpack.c.bf16 %v1440_v57, %v1439_v52  ;;  %v1731_v36 = vmul.f32 %v1434_v7, %v2437_v42  ;;  %v2095_v40 = vpack.c.bf16 %v1729_v22, %v1728_v31 }
 0x2c6   :  { %v2092_v23 = vpack.c.bf16 %v1442_v63, %v1441_v58  ;;  %v2098_v14 = vpack.c.bf16 %v1731_v36, %v1730_v59 }
 0x311   :  { %v835_v53 = vpop.trf.xlu1 }
 0x312   :  { %1913 = vmatmul.mubr.msk.f32.vlgmr.msra.gmra.mrb[8].mxu0 %vm851_vm8, %v835_v53 }
 0x313   :  { %2090 = vmatpush3.bf16.msra.mxu0 %v2089_v61  ;;  %1934 = vmatprep.mubr.msk.f32.mxu0 %vm2331_vm0, %v2328_v0 }
 0x314   :  { %2091 = vmatprep.subr.bf16.mxu0 %v2330_v54 }
 0x317   :  { %2093 = vmatpush3.bf16.msra.mxu0 %v2092_v23 }
 0x321   :  { %v1125_v25 = vpop.trf.xlu0 }
 0x322   :  { %1924 = vmatmul.mubr.msk.f32.vlgmr.msra.gmra.mrb[8].mxu1 %vm851_vm8, %v1125_v25 }
 0x323   :  { %2096 = vmatpush3.bf16.msra.mxu1 %v2095_v40  ;;  %1945 = vmatprep.mubr.msk.f32.mxu1 %vm2331_vm0, %v2328_v0 }
 0x324   :  { %2097 = vmatprep.subr.bf16.mxu1 %v2330_v54 }
 0x327   :  { %2099 = vmatpush3.bf16.msra.mxu1 %v2098_v14 }
 0x331   :  { %v1459_v9 = vpop.trf.xlu0 }
 0x332   :  { %1935 = vmatmul.mubr.msk.f32.vlgmr.msra.gmra.mrb[10].mxu0 %vm851_vm8, %v1459_v9 }
 0x333   :  { %v1748_v35 = vpop.trf.xlu1 }
 0x334   :  { %1946 = vmatmul.mubr.msk.f32.vlgmr.msra.gmra.mrb[10].mxu1 %vm851_vm8, %v1748_v35 }
 0x3e5   :  { %v921_v20 = vpop.f32.mrb[8].mxu0 }
 0x3e6   :  { %v1837_v42 = vadd.f32 %v921_v20, %v2695_v5  ;;  %v1914_v27 = vpop.f32.mrb[9].mxu0 }
 0x3f5   :  { %v1210_v12 = vpop.f32.mrb[8].mxu1 }
 0x3f6   :  { %v1838_v55 = vadd.f32 %v1837_v42, %v1210_v12  ;;  %v1925_v62 = vpop.f32.mrb[9].mxu1 }
 0x3f8   :  { %v1839_v0 = vmax.f32 %v1838_v55, 0.0 }
 0x3fa   :  { %1840 = vst [vmem:[#allocation10] sm:$0xff] %v1839_v0 }
 0x3fb   :  { %2277 = shalt.err (!%p2274_p8)
}
 0x3fc   :  { %s2278_s9 = scalar_lea.hbm %s2915_s6, 128 }
 0x3fd   :  { %p2279_p9 = scmp.ne.s32.totalorder %s2915_s6, %s2278_s9  ;;  %p2282_p10 = scmp.lt.u32.totalorder %s2278_s9, %s2915_s6 }
 0x3ff   :  { %p2284_p11 = pnand %p2282_p10, %p2279_p9 }
 0x401   :  { %2287 = shalt.err (!%p2284_p11)
}
 0x402   :  { %1854 = dma.vmem_to_hbm [thread:$0]  %s1852_s28, 128, %s2915_s6, [#allocation4]  }
 0x403   :  { %s2333_s0 = smov [#allocation11]  }
 0x404   :  { %s1861_s16 = sshll.u32 %s2333_s0, 4  ;;  %s1862_s16 = int_to_ptr.vmem [resolvable:$true] %s1861_s16 }
 0x405   :  { %v1544_v54 = vpop.f32.mrb[10].mxu0  ;;  %s2288_s17 = scalar_lea.vmem %s1862_s16, 128  ;;  %p2293_p13 = scmp.lt.s32.totalorder %s1862_s16, %s1862_s16 }
 0x406   :  { %v1841_v5 = vadd.f32 %v1544_v54, %v2790_v1  ;;  %v1936_v2 = vpop.f32.mrb[11].mxu0  ;;  %p2289_p12 = scmp.ne.s32.totalorder %s1862_s16, %s2288_s17  ;;  %p2294_p0 = scmp.lt.s32.totalorder %s2288_s17, %s2288_s17 }
 0x407   :  { %v1833_v30 = vpop.f32.mrb[10].mxu1 }
 0x408   :  { %v1842_v29 = vadd.f32 %v1841_v5, %v1833_v30  ;;  %v1947_v39 = vpop.f32.mrb[11].mxu1  ;;  %p2295_p1 = por %p2294_p0, %p2293_p13 }
 0x40a   :  { %v1843_v16 = vmax.f32 %v1842_v29, 0.0  ;;  %p2296_p2 = pnand %p2295_p1, %p2289_p12 }
 0x40c   :  { %1844 = vst [vmem:[#allocation11] sm:$0xff] %v1843_v16 }
 0x40d   :  { %2299 = shalt.err (!%p2296_p2)
}
 0x40e   :  { %s2300_s19 = scalar_lea.hbm %s2916_s7, 128 }
 0x40f   :  { %p2301_p3 = scmp.ne.s32.totalorder %s2916_s7, %s2300_s19  ;;  %p2304_p4 = scmp.lt.u32.totalorder %s2300_s19, %s2916_s7 }
 0x411   :  { %p2306_p5 = pnand %p2304_p4, %p2301_p3 }
 0x413   :  { %2309 = shalt.err (!%p2306_p5)
}
 0x414   :  { %1864 = dma.vmem_to_hbm [thread:$0]  %s1862_s16, 128, %s2916_s7, [#allocation12]  }
 0x415   :  { %2316 = dma.done.wait [#allocation4], 128  }
 0x416   :  { %2317 = vsyncadd [#allocation4], 4294967168 }
 0x417   :  { %2318 = dma.done.wait [#allocation12], 128  }
 0x418   :  { %2319 = vsyncadd [#allocation12], 4294967168 }
 0x419   :  { %1871 = vsyncpa [#allocation3], 1 }
 0x41a   :  { %1872 = vsyncpa [#allocation6], 1 }
 0x41b   :  { %1873 = vsyncpa [#allocation9], 1 }
 0x41c   :  { %1874 = vsyncpa [#allocation4], 1 }
 0x41d   :  { %1875 = vsyncpa [#allocation12], 1 }

</bundles_post_ra>
